<compile_context>
chip_gen: v5e
topology: v5e:2x2
jax: 0.10.0
libtpu: 0.0.40
codegen_flags: <defaults>
</compile_context>

<pallas_src>
import jax
import jax.numpy as jnp
from jax.experimental import pallas as pl
from jax.experimental.pallas import tpu as pltpu

EPS = 1e-5  # PyTorch BatchNorm2d default eps


# --------------------------------------------------------------------------- VMEM budgeting
def _vmem_limit_bytes():
    cap = 128 << 20
    try:
        cap = int(pltpu.get_tpu_info().vmem_capacity_bytes)
    except Exception:
        pass
    # <= 3/4 of physical (48 MiB on v7x), capped at 64 MiB (plenty for v5e/v6e).
    return min(64 << 20, (cap * 3) // 4)


_VMEM_LIMIT = _vmem_limit_bytes()
_BLOCK_BUDGET = 24 << 20  # rough budget for per-step resident blocks


def _cparams():
    return pltpu.CompilerParams(
        dimension_semantics=("parallel",),
        vmem_limit_bytes=_VMEM_LIMIT,
    )


def _per_image_vmem(H, W, cin, mid, cout, proj):
    """Rough per-image VMEM bytes (dominant residents, double-buffered I/O)."""
    hw, hwp = H * W, (H + 2) * (W + 2)
    mtot = mid + (cout if proj else 0)
    p1 = (2 * hwp * cin * 4 + 2 * hw * mid * 4
          + (2 * hw * cout * 4 if proj else 0)
          + hw * mtot * 4 + hw * cin * 2)
    p2 = (2 * hw * mid * 4 + hwp * mid * 2 + 2 * hw * cout * 4
          + hw * cout * 4 + hw * mid * 2)
    return max(p1, p2)


def _pick_nb(n, per_image_bytes, budget=_BLOCK_BUDGET, min_blocks=4):
    """Largest divisor Nb of n that fits the budget while keeping >= min_blocks
    grid steps (megacore sharding + software pipelining)."""
    min_blocks = min(min_blocks, n)
    best = 1
    for d in range(1, n + 1):
        if n % d == 0 and d * per_image_bytes <= budget and n // d >= min_blocks:
            best = d
    return best


# --------------------------------------------------------------------------- in-kernel helpers
def _sum_sumsq(y):
    """(M, C) f32 -> (2, C): per-channel sum and sum of squares."""
    return jnp.concatenate([jnp.sum(y, axis=0, keepdims=True),
                            jnp.sum(y * y, axis=0, keepdims=True)], axis=0)


def _conv3x3_taps(x_pad, w_taps, nb, H, W, cin, nout):
    """x_pad: (Nb, H+2, W+2, Cin) value (compute dtype); w_taps: (9, Cin, Nout).

    9 accumulating K=Cin dots (no 9x im2col copy).  f32 accumulator.
    """
    M = nb * H * W
    acc = jnp.zeros((M, nout), jnp.float32)
    for kh in range(3):
        for kw in range(3):
            lhs = x_pad[:, kh:kh + H, kw:kw + W, :].reshape(M, cin)
            acc = acc + jnp.dot(lhs, w_taps[kh * 3 + kw],
                                preferred_element_type=jnp.float32)
    return acc


# --------------------------------------------------------------------------- kernels
def _make_pass1_kernel(nb, H, W, cin, mid, cout, proj):
    """conv1 (bias dropped; cancelled by BN1) fused with the residual conv
    (single wide RHS so the patch stream hits the MXU once) + partial stats."""

    def kernel(*refs):
        if proj:
            xp_ref, w_ref, br_ref, y1_ref, s1_ref, res_ref = refs
        else:
            xp_ref, w_ref, y1_ref, s1_ref = refs

        x = xp_ref[...].astype(w_ref.dtype)            # one cast, sliced 9x
        mtot = mid + (cout if proj else 0)
        acc = _conv3x3_taps(x, w_ref, nb, H, W, cin, mtot)   # (Nb*H*W, mtot) f32

        y1 = acc[:, :mid]
        y1_ref[...] = y1.reshape(nb, H, W, mid)
        s1_ref[0] = _sum_sumsq(y1)                      # (2, mid) f32

        if proj:
            res = acc[:, mid:] + br_ref[...]            # residual conv keeps bias
            res_ref[...] = res.reshape(nb, H, W, cout)

    return kernel


def _make_pass2_kernel(nb, H, W, mid, cout):
    """BN1 affine + ReLU + conv2 (bias dropped; cancelled by BN2) + partial stats."""

    def kernel(y1_ref, sc1_ref, sh1_ref, w2_ref, y2_ref, s2_ref, pad_ref):
        # Zero only the 1-pixel halo border; interior is fully overwritten.
        zrow = jnp.zeros((nb, 1, W + 2, mid), pad_ref.dtype)
        zcol = jnp.zeros((nb, H, 1, mid), pad_ref.dtype)
        pad_ref[:, 0:1, :, :] = zrow
        pad_ref[:, H + 1:H + 2, :, :] = zrow
        pad_ref[:, 1:H + 1, 0:1, :] = zcol
        pad_ref[:, 1:H + 1, W + 1:W + 2, :] = zcol

        # BN1 affine + ReLU in f32; interior stored in the matmul compute dtype.
        h1 = jnp.maximum(y1_ref[...] * sc1_ref[...] + sh1_ref[...], 0.0)
        pad_ref[:, 1:H + 1, 1:W + 1, :] = h1.astype(pad_ref.dtype)

        x = pad_ref[...]
        acc = _conv3x3_taps(x, w2_ref, nb, H, W, mid, cout)   # (Nb*H*W, cout) f32
        y2_ref[...] = acc.reshape(nb, H, W, cout)
        s2_ref[0] = _sum_sumsq(acc)                     # (2, cout) f32

    return kernel


# --------------------------------------------------------------------------- pallas_call wrappers
def _pass1(xp, w_all, br, nb, mid, cout, proj):
    n, hp, wp, cin = xp.shape
    H, W = hp - 2, wp - 2
    nblk = n // nb

    in_specs = [pl.BlockSpec((nb, hp, wp, cin), lambda i: (i, 0, 0, 0)),
                pl.BlockSpec(w_all.shape, lambda i: (0, 0, 0))]
    args = [xp, w_all]
    out_shape = [jax.ShapeDtypeStruct((n, H, W, mid), jnp.float32),
                 jax.ShapeDtypeStruct((nblk, 2, mid), jnp.float32)]
    out_specs = [pl.BlockSpec((nb, H, W, mid), lambda i: (i, 0, 0, 0)),
                 pl.BlockSpec((1, 2, mid), lambda i: (i, 0, 0))]
    if proj:
        in_specs.append(pl.BlockSpec(br.shape, lambda i: (0, 0)))
        args.append(br)
        out_shape.append(jax.ShapeDtypeStruct((n, H, W, cout), jnp.float32))
        out_specs.append(pl.BlockSpec((nb, H, W, cout), lambda i: (i, 0, 0, 0)))

    return pl.pallas_call(
        _make_pass1_kernel(nb, H, W, cin, mid, cout, proj),
        grid=(nblk,),
        in_specs=in_specs,
        out_shape=tuple(out_shape),
        out_specs=tuple(out_specs),
        compiler_params=_cparams(),
    )(*args)


def _pass2(y1, scale1, shift1, w2_taps, nb, compute_dtype):
    n, H, W, mid = y1.shape
    cout = w2_taps.shape[-1]
    nblk = n // nb
    return pl.pallas_call(
        _make_pass2_kernel(nb, H, W, mid, cout),
        grid=(nblk,),
        in_specs=[pl.BlockSpec((nb, H, W, mid), lambda i: (i, 0, 0, 0)),
                  pl.BlockSpec(scale1.shape, lambda i: (0, 0)),
                  pl.BlockSpec(shift1.shape, lambda i: (0, 0)),
                  pl.BlockSpec(w2_taps.shape, lambda i: (0, 0, 0))],
        out_shape=(jax.ShapeDtypeStruct((n, H, W, cout), jnp.float32),
                   jax.ShapeDtypeStruct((nblk, 2, cout), jnp.float32)),
        out_specs=(pl.BlockSpec((nb, H, W, cout), lambda i: (i, 0, 0, 0)),
                   pl.BlockSpec((1, 2, cout), lambda i: (i, 0, 0))),
        scratch_shapes=[pltpu.VMEM((nb, H + 2, W + 2, mid), compute_dtype)],
        compiler_params=_cparams(),
    )(y1, scale1, shift1, w2_taps)


# --------------------------------------------------------------------------- glue
def _bn_affine(partial_stats, gamma, beta, count):
    """(nblk, 2, C) per-block sum/sumsq -> per-channel (scale, shift)."""
    tot = jnp.sum(partial_stats, axis=0)                 # (2, C)
    mean = tot[0] / count
    var = jnp.maximum(tot[1] / count - mean * mean, 0.0)
    scale = gamma * jax.lax.rsqrt(var + EPS)             # (1, C)
    shift = beta - mean * scale                          # (1, C)
    return scale, shift


def init_params(key, in_dim, out_dim):
    mid = 2 * in_dim
    ks = jax.random.split(key, 10)
    s = 0.1
    p = {
        "w1": s * jax.random.normal(ks[0], (3, 3, in_dim, mid), jnp.float32),
        "b1": s * jax.random.normal(ks[1], (1, mid), jnp.float32),
        "g1": 1.0 + s * jax.random.normal(ks[2], (1, mid), jnp.float32),
        "beta1": s * jax.random.normal(ks[3], (1, mid), jnp.float32),
        "w2": s * jax.random.normal(ks[4], (3, 3, mid, out_dim), jnp.float32),
        "b2": s * jax.random.normal(ks[5], (1, out_dim), jnp.float32),
        "g2": 1.0 + s * jax.random.normal(ks[6], (1, out_dim), jnp.float32),
        "beta2": s * jax.random.normal(ks[7], (1, out_dim), jnp.float32),
    }
    if in_dim != out_dim:  # residual branch is a 3x3 conv, else identity
        p["wr"] = s * jax.random.normal(ks[8], (3, 3, in_dim, out_dim), jnp.float32)
        p["br"] = s * jax.random.normal(ks[9], (1, out_dim), jnp.float32)
    return p


def res_block_forward(x_nchw, params, compute_dtype=jnp.bfloat16):
    n, cin, h, w = x_nchw.shape
    mid = params["w1"].shape[3]
    cout = params["w2"].shape[3]
    proj = "wr" in params

    x = jnp.transpose(x_nchw, (0, 2, 3, 1)).astype(jnp.float32)        # NHWC
    xp = jnp.pad(x, ((0, 0), (1, 1), (1, 1), (0, 0)))                  # SAME halo

    # Weights as (9, Cin, Cout) tap stacks in the MXU compute dtype.
    # Pass 1 uses one fused RHS = [w1 | wr] so the patch stream is read once.
    w1 = params["w1"].reshape(9, cin, mid)
    if proj:
        w_all = jnp.concatenate(
            [w1, params["wr"].reshape(9, cin, cout)], axis=-1).astype(compute_dtype)
    else:
        w_all = w1.astype(compute_dtype)
    w2 = params["w2"].reshape(9, mid, cout).astype(compute_dtype)

    nb = _pick_nb(n, _per_image_vmem(h, w, cin, mid, cout, proj))

    # Pass 1: conv1 (+ fused residual conv) + per-block BN1 partial stats.
    # b1 intentionally omitted: BN1 mean subtraction cancels it exactly.
    if proj:
        y1, s1, res = _pass1(xp, w_all, params["br"], nb, mid, cout, proj)
    else:
        y1, s1 = _pass1(xp, w_all, None, nb, mid, cout, proj)
        res = x                                                        # identity

    count = float(n * h * w)
    scale1, shift1 = _bn_affine(s1, params["g1"], params["beta1"], count)

    # Pass 2: BN1 + ReLU + conv2 (b2 cancelled by BN2) + partial stats.
    y2, s2 = _pass2(y1, scale1, shift1, w2, nb, compute_dtype)
    scale2, shift2 = _bn_affine(s2, params["g2"], params["beta2"], count)

    # Epilogue: BN2 affine + residual add.  Memory-bound elementwise; left to
    # XLA which fuses it into a single HBM pass (per perf review).
    out = y2 * scale2 + shift2 + res
    return jnp.transpose(out, (0, 3, 1, 2))                            # NCHW


# --------------------------------------------------------------------------- reference
def _ref_conv(x, w, b):  # NHWC activations, HWIO weights
    y = jax.lax.conv_general_dilated(
        x, w, (1, 1), "SAME", dimension_numbers=("NHWC", "HWIO", "NHWC"))
    return y + b.reshape(1, 1, 1, -1)


def _ref_bn(y, g, bt):
    mean = y.mean(axis=(0, 1, 2), keepdims=True)
    var = ((y - mean) ** 2).mean(axis=(0, 1, 2), keepdims=True)
    return (y - mean) * jax.lax.rsqrt(var + EPS) * g.reshape(1, 1, 1, -1) \
        + bt.reshape(1, 1, 1, -1)


def res_block_ref(x_nchw, params):
    x = jnp.transpose(x_nchw, (0, 2, 3, 1)).astype(jnp.float32)
    h1 = jax.nn.relu(_ref_bn(_ref_conv(x, params["w1"], params["b1"]),
                             params["g1"], params["beta1"]))
    f = _ref_bn(_ref_conv(h1, params["w2"], params["b2"]),
                params["g2"], params["beta2"])
    r = _ref_conv(x, params["wr"], params["br"]) if "wr" in params else x
    return jnp.transpose(f + r, (0, 3, 1, 2))


if __name__ == "__main__":
    key = jax.random.PRNGKey(0)
    kx, kp, kp2 = jax.random.split(key, 3)
    N, C_IN, C_OUT, H, W = 2, 4, 8, 16, 16

    x = jax.random.normal(kx, (N, C_IN, H, W), jnp.float32)

    # Projection-residual config (in_dim != out_dim -> residual is a 3x3 conv).
    params = init_params(kp, C_IN, C_OUT)
    ref = res_block_ref(x, params)

    # Exact-math check: f32 MXU path matches the reference tightly.
    out_f32 = jax.block_until_ready(
        res_block_forward(x, params, compute_dtype=jnp.float32))
    assert out_f32.shape == (N, C_OUT, H, W), out_f32.shape
    err = float(jnp.max(jnp.abs(out_f32 - ref)))
    assert jnp.allclose(out_f32, ref, atol=1e-3, rtol=1e-3), err

    # Fast path: bf16 MXU inputs, f32 accumulation (tolerance reflects bf16
    # input rounding propagated through two convs + batch-norms).
    out_bf16 = jax.block_until_ready(res_block_forward(x, params))
    err_bf = float(jnp.max(jnp.abs(out_bf16 - ref)))
    assert jnp.allclose(out_bf16, ref, atol=5e-2, rtol=5e-2), err_bf

    # Identity-residual config (in_dim == out_dim).
    params_id = init_params(kp2, C_IN, C_IN)
    ref_id = res_block_ref(x, params_id)
    out_id = jax.block_until_ready(
        res_block_forward(x, params_id, compute_dtype=jnp.float32))
    err_id = float(jnp.max(jnp.abs(out_id - ref_id)))
    assert jnp.allclose(out_id, ref_id, atol=1e-3, rtol=1e-3), err_id

    out_id_bf = jax.block_until_ready(res_block_forward(x, params_id))
    err_id_bf = float(jnp.max(jnp.abs(out_id_bf - ref_id)))
    assert jnp.allclose(out_id_bf, ref_id, atol=5e-2, rtol=5e-2), err_id_bf

    print("KERNEL_OK")
</pallas_src>

<mosaic_0001>
module attributes {stable_mosaic.version = 11 : i64} {
  func.func @kernel(%arg0: i32, %arg1: memref<1x18x18x4xf32, #tpu.memory_space<vmem>>, %arg2: memref<9x4x16xf32, #tpu.memory_space<vmem>>, %arg3: memref<1x8xf32, #tpu.memory_space<vmem>>, %arg4: memref<1x16x16x8xf32, #tpu.memory_space<vmem>>, %arg5: memref<1x2x8xf32, #tpu.memory_space<vmem>>, %arg6: memref<1x16x16x8xf32, #tpu.memory_space<vmem>>) attributes {dimension_semantics = [#tpu.dimension_semantics<parallel>], iteration_bounds = array<i64: 2>, scalar_prefetch = 0 : i64, scratch_operands = 0 : i64, tpu.core_type = #tpu.core_type<tc>, window_params = [{transform_indices = @transform_0, window_bounds = array<i64: 1, 18, 18, 4>}, {pipeline_mode = #tpu.pipeline_mode<synchronous>, transform_indices = @transform_1, window_bounds = array<i64: 9, 4, 16>}, {pipeline_mode = #tpu.pipeline_mode<synchronous>, transform_indices = @transform_2, window_bounds = array<i64: 1, 8>}, {transform_indices = @transform_3, window_bounds = array<i64: 1, 16, 16, 8>}, {transform_indices = @transform_4, window_bounds = array<i64: 1, 2, 8>}, {transform_indices = @transform_5, window_bounds = array<i64: 1, 16, 16, 8>}]} {
    %c0 = arith.constant 0 : index
    %c0_0 = arith.constant 0 : index
    %c0_1 = arith.constant 0 : index
    %c0_2 = arith.constant 0 : index
    %0 = vector.load %arg1[%c0, %c0_0, %c0_1, %c0_2] : memref<1x18x18x4xf32, #tpu.memory_space<vmem>>, vector<1x18x18x4xf32>
    %cst = arith.constant 0.000000e+00 : f32
    %1 = vector.broadcast %cst : f32 to vector<256x16xf32>
    %2 = vector.extract_strided_slice %0 {offsets = [0, 0, 0, 0], sizes = [1, 16, 16, 4], strides = [1, 1, 1, 1]} : vector<1x18x18x4xf32> to vector<1x16x16x4xf32>
    %3 = vector.shape_cast %2 : vector<1x16x16x4xf32> to vector<256x4xf32>
    %c0_3 = arith.constant 0 : index
    %c0_4 = arith.constant 0 : index
    %c0_5 = arith.constant 0 : index
    %4 = vector.load %arg2[%c0_3, %c0_4, %c0_5] : memref<9x4x16xf32, #tpu.memory_space<vmem>>, vector<1x4x16xf32>
    %5 = vector.shape_cast %4 : vector<1x4x16xf32> to vector<4x16xf32>
    %cst_6 = arith.constant dense<0.000000e+00> : vector<256x16xf32>
    %6 = tpu.matmul %3, %5, %cst_6 {dimension_numbers = #tpu.dot_dimension_numbers<[1], [0], [0], [1], [0, 0, 1, 1], [], []>} : vector<256x4xf32>, vector<4x16xf32>, vector<256x16xf32> -> vector<256x16xf32>
    %7 = arith.addf %1, %6 : vector<256x16xf32>
    %8 = vector.extract_strided_slice %0 {offsets = [0, 0, 1, 0], sizes = [1, 16, 16, 4], strides = [1, 1, 1, 1]} : vector<1x18x18x4xf32> to vector<1x16x16x4xf32>
    %9 = vector.shape_cast %8 : vector<1x16x16x4xf32> to vector<256x4xf32>
    %c1 = arith.constant 1 : index
    %c0_7 = arith.constant 0 : index
    %c0_8 = arith.constant 0 : index
    %10 = vector.load %arg2[%c1, %c0_7, %c0_8] : memref<9x4x16xf32, #tpu.memory_space<vmem>>, vector<1x4x16xf32>
    %11 = vector.shape_cast %10 : vector<1x4x16xf32> to vector<4x16xf32>
    %cst_9 = arith.constant dense<0.000000e+00> : vector<256x16xf32>
    %12 = tpu.matmul %9, %11, %cst_9 {dimension_numbers = #tpu.dot_dimension_numbers<[1], [0], [0], [1], [0, 0, 1, 1], [], []>} : vector<256x4xf32>, vector<4x16xf32>, vector<256x16xf32> -> vector<256x16xf32>
    %13 = arith.addf %7, %12 : vector<256x16xf32>
    %14 = vector.extract_strided_slice %0 {offsets = [0, 0, 2, 0], sizes = [1, 16, 16, 4], strides = [1, 1, 1, 1]} : vector<1x18x18x4xf32> to vector<1x16x16x4xf32>
    %15 = vector.shape_cast %14 : vector<1x16x16x4xf32> to vector<256x4xf32>
    %c2 = arith.constant 2 : index
    %c0_10 = arith.constant 0 : index
    %c0_11 = arith.constant 0 : index
    %16 = vector.load %arg2[%c2, %c0_10, %c0_11] : memref<9x4x16xf32, #tpu.memory_space<vmem>>, vector<1x4x16xf32>
    %17 = vector.shape_cast %16 : vector<1x4x16xf32> to vector<4x16xf32>
    %cst_12 = arith.constant dense<0.000000e+00> : vector<256x16xf32>
    %18 = tpu.matmul %15, %17, %cst_12 {dimension_numbers = #tpu.dot_dimension_numbers<[1], [0], [0], [1], [0, 0, 1, 1], [], []>} : vector<256x4xf32>, vector<4x16xf32>, vector<256x16xf32> -> vector<256x16xf32>
    %19 = arith.addf %13, %18 : vector<256x16xf32>
    %20 = vector.extract_strided_slice %0 {offsets = [0, 1, 0, 0], sizes = [1, 16, 16, 4], strides = [1, 1, 1, 1]} : vector<1x18x18x4xf32> to vector<1x16x16x4xf32>
    %21 = vector.shape_cast %20 : vector<1x16x16x4xf32> to vector<256x4xf32>
    %c3 = arith.constant 3 : index
    %c0_13 = arith.constant 0 : index
    %c0_14 = arith.constant 0 : index
    %22 = vector.load %arg2[%c3, %c0_13, %c0_14] : memref<9x4x16xf32, #tpu.memory_space<vmem>>, vector<1x4x16xf32>
    %23 = vector.shape_cast %22 : vector<1x4x16xf32> to vector<4x16xf32>
    %cst_15 = arith.constant dense<0.000000e+00> : vector<256x16xf32>
    %24 = tpu.matmul %21, %23, %cst_15 {dimension_numbers = #tpu.dot_dimension_numbers<[1], [0], [0], [1], [0, 0, 1, 1], [], []>} : vector<256x4xf32>, vector<4x16xf32>, vector<256x16xf32> -> vector<256x16xf32>
    %25 = arith.addf %19, %24 : vector<256x16xf32>
    %26 = vector.extract_strided_slice %0 {offsets = [0, 1, 1, 0], sizes = [1, 16, 16, 4], strides = [1, 1, 1, 1]} : vector<1x18x18x4xf32> to vector<1x16x16x4xf32>
    %27 = vector.shape_cast %26 : vector<1x16x16x4xf32> to vector<256x4xf32>
    %c4 = arith.constant 4 : index
    %c0_16 = arith.constant 0 : index
    %c0_17 = arith.constant 0 : index
    %28 = vector.load %arg2[%c4, %c0_16, %c0_17] : memref<9x4x16xf32, #tpu.memory_space<vmem>>, vector<1x4x16xf32>
    %29 = vector.shape_cast %28 : vector<1x4x16xf32> to vector<4x16xf32>
    %cst_18 = arith.constant dense<0.000000e+00> : vector<256x16xf32>
    %30 = tpu.matmul %27, %29, %cst_18 {dimension_numbers = #tpu.dot_dimension_numbers<[1], [0], [0], [1], [0, 0, 1, 1], [], []>} : vector<256x4xf32>, vector<4x16xf32>, vector<256x16xf32> -> vector<256x16xf32>
    %31 = arith.addf %25, %30 : vector<256x16xf32>
    %32 = vector.extract_strided_slice %0 {offsets = [0, 1, 2, 0], sizes = [1, 16, 16, 4], strides = [1, 1, 1, 1]} : vector<1x18x18x4xf32> to vector<1x16x16x4xf32>
    %33 = vector.shape_cast %32 : vector<1x16x16x4xf32> to vector<256x4xf32>
    %c5 = arith.constant 5 : index
    %c0_19 = arith.constant 0 : index
    %c0_20 = arith.constant 0 : index
    %34 = vector.load %arg2[%c5, %c0_19, %c0_20] : memref<9x4x16xf32, #tpu.memory_space<vmem>>, vector<1x4x16xf32>
    %35 = vector.shape_cast %34 : vector<1x4x16xf32> to vector<4x16xf32>
    %cst_21 = arith.constant dense<0.000000e+00> : vector<256x16xf32>
    %36 = tpu.matmul %33, %35, %cst_21 {dimension_numbers = #tpu.dot_dimension_numbers<[1], [0], [0], [1], [0, 0, 1, 1], [], []>} : vector<256x4xf32>, vector<4x16xf32>, vector<256x16xf32> -> vector<256x16xf32>
    %37 = arith.addf %31, %36 : vector<256x16xf32>
    %38 = vector.extract_strided_slice %0 {offsets = [0, 2, 0, 0], sizes = [1, 16, 16, 4], strides = [1, 1, 1, 1]} : vector<1x18x18x4xf32> to vector<1x16x16x4xf32>
    %39 = vector.shape_cast %38 : vector<1x16x16x4xf32> to vector<256x4xf32>
    %c6 = arith.constant 6 : index
    %c0_22 = arith.constant 0 : index
    %c0_23 = arith.constant 0 : index
    %40 = vector.load %arg2[%c6, %c0_22, %c0_23] : memref<9x4x16xf32, #tpu.memory_space<vmem>>, vector<1x4x16xf32>
    %41 = vector.shape_cast %40 : vector<1x4x16xf32> to vector<4x16xf32>
    %cst_24 = arith.constant dense<0.000000e+00> : vector<256x16xf32>
    %42 = tpu.matmul %39, %41, %cst_24 {dimension_numbers = #tpu.dot_dimension_numbers<[1], [0], [0], [1], [0, 0, 1, 1], [], []>} : vector<256x4xf32>, vector<4x16xf32>, vector<256x16xf32> -> vector<256x16xf32>
    %43 = arith.addf %37, %42 : vector<256x16xf32>
    %44 = vector.extract_strided_slice %0 {offsets = [0, 2, 1, 0], sizes = [1, 16, 16, 4], strides = [1, 1, 1, 1]} : vector<1x18x18x4xf32> to vector<1x16x16x4xf32>
    %45 = vector.shape_cast %44 : vector<1x16x16x4xf32> to vector<256x4xf32>
    %c7 = arith.constant 7 : index
    %c0_25 = arith.constant 0 : index
    %c0_26 = arith.constant 0 : index
    %46 = vector.load %arg2[%c7, %c0_25, %c0_26] : memref<9x4x16xf32, #tpu.memory_space<vmem>>, vector<1x4x16xf32>
    %47 = vector.shape_cast %46 : vector<1x4x16xf32> to vector<4x16xf32>
    %cst_27 = arith.constant dense<0.000000e+00> : vector<256x16xf32>
    %48 = tpu.matmul %45, %47, %cst_27 {dimension_numbers = #tpu.dot_dimension_numbers<[1], [0], [0], [1], [0, 0, 1, 1], [], []>} : vector<256x4xf32>, vector<4x16xf32>, vector<256x16xf32> -> vector<256x16xf32>
    %49 = arith.addf %43, %48 : vector<256x16xf32>
    %50 = vector.extract_strided_slice %0 {offsets = [0, 2, 2, 0], sizes = [1, 16, 16, 4], strides = [1, 1, 1, 1]} : vector<1x18x18x4xf32> to vector<1x16x16x4xf32>
    %51 = vector.shape_cast %50 : vector<1x16x16x4xf32> to vector<256x4xf32>
    %c8 = arith.constant 8 : index
    %c0_28 = arith.constant 0 : index
    %c0_29 = arith.constant 0 : index
    %52 = vector.load %arg2[%c8, %c0_28, %c0_29] : memref<9x4x16xf32, #tpu.memory_space<vmem>>, vector<1x4x16xf32>
    %53 = vector.shape_cast %52 : vector<1x4x16xf32> to vector<4x16xf32>
    %cst_30 = arith.constant dense<0.000000e+00> : vector<256x16xf32>
    %54 = tpu.matmul %51, %53, %cst_30 {dimension_numbers = #tpu.dot_dimension_numbers<[1], [0], [0], [1], [0, 0, 1, 1], [], []>} : vector<256x4xf32>, vector<4x16xf32>, vector<256x16xf32> -> vector<256x16xf32>
    %55 = arith.addf %49, %54 : vector<256x16xf32>
    %56 = vector.extract_strided_slice %55 {offsets = [0, 0], sizes = [256, 8], strides = [1, 1]} : vector<256x16xf32> to vector<256x8xf32>
    %57 = vector.shape_cast %56 : vector<256x8xf32> to vector<1x16x16x8xf32>
    %c0_31 = arith.constant 0 : index
    %c0_32 = arith.constant 0 : index
    %c0_33 = arith.constant 0 : index
    %c0_34 = arith.constant 0 : index
    %58 = vector.load %arg4[%c0_31, %c0_32, %c0_33, %c0_34] : memref<1x16x16x8xf32, #tpu.memory_space<vmem>>, vector<1x16x16x8xf32>
    tpu.vector_store %arg4[%c0_31, %c0_32, %c0_33, %c0_34], %57 {strides = array<i32>} : memref<1x16x16x8xf32, #tpu.memory_space<vmem>>, vector<1x16x16x8xf32>,
    %cst_35 = arith.constant dense<0.000000e+00> : vector<8xf32>
    %59 = vector.multi_reduction <add>, %56, %cst_35 [0] : vector<256x8xf32> to vector<8xf32>
    %60 = vector.shape_cast %59 : vector<8xf32> to vector<1x8xf32>
    %61 = arith.mulf %56, %56 : vector<256x8xf32>
    %cst_36 = arith.constant dense<0.000000e+00> : vector<8xf32>
    %62 = vector.multi_reduction <add>, %61, %cst_36 [0] : vector<256x8xf32> to vector<8xf32>
    %63 = vector.shape_cast %62 : vector<8xf32> to vector<1x8xf32>
    %64 = tpu.concatenate %60, %63 in 0 : vector<1x8xf32>, vector<1x8xf32> -> vector<2x8xf32>
    %c0_37 = arith.constant 0 : index
    %c0_38 = arith.constant 0 : index
    %c0_39 = arith.constant 0 : index
    %65 = vector.load %arg5[%c0_37, %c0_38, %c0_39] : memref<1x2x8xf32, #tpu.memory_space<vmem>>, vector<1x2x8xf32>
    %66 = vector.shape_cast %65 : vector<1x2x8xf32> to vector<2x8xf32>
    %67 = vector.shape_cast %64 : vector<2x8xf32> to vector<1x2x8xf32>
    tpu.vector_store %arg5[%c0_37, %c0_38, %c0_39], %67 {strides = array<i32>} : memref<1x2x8xf32, #tpu.memory_space<vmem>>, vector<1x2x8xf32>,
    %68 = vector.extract_strided_slice %55 {offsets = [0, 8], sizes = [256, 8], strides = [1, 1]} : vector<256x16xf32> to vector<256x8xf32>
    %c0_40 = arith.constant 0 : index
    %c0_41 = arith.constant 0 : index
    %69 = vector.load %arg3[%c0_40, %c0_41] : memref<1x8xf32, #tpu.memory_space<vmem>>, vector<1x8xf32>
    %70 = vector.broadcast %69 : vector<1x8xf32> to vector<256x8xf32>
    %71 = arith.addf %68, %70 : vector<256x8xf32>
    %72 = vector.shape_cast %71 : vector<256x8xf32> to vector<1x16x16x8xf32>
    %c0_42 = arith.constant 0 : index
    %c0_43 = arith.constant 0 : index
    %c0_44 = arith.constant 0 : index
    %c0_45 = arith.constant 0 : index
    %73 = vector.load %arg6[%c0_42, %c0_43, %c0_44, %c0_45] : memref<1x16x16x8xf32, #tpu.memory_space<vmem>>, vector<1x16x16x8xf32>
    tpu.vector_store %arg6[%c0_42, %c0_43, %c0_44, %c0_45], %72 {strides = array<i32>} : memref<1x16x16x8xf32, #tpu.memory_space<vmem>>, vector<1x16x16x8xf32>,
    return
  }
  func.func @transform_0(%arg0: i32) -> (i32, i32, i32, i32) {
    %c0_i32 = arith.constant 0 : i32
    %c0_i32_0 = arith.constant 0 : i32
    %c0_i32_1 = arith.constant 0 : i32
    %c0_i32_2 = arith.constant 0 : i32
    return %arg0, %c0_i32, %c0_i32_0, %c0_i32_1 : i32, i32, i32, i32
  }
  func.func @transform_1(%arg0: i32) -> (i32, i32, i32) {
    %c0_i32 = arith.constant 0 : i32
    %c0_i32_0 = arith.constant 0 : i32
    %c0_i32_1 = arith.constant 0 : i32
    %c0_i32_2 = arith.constant 0 : i32
    return %c0_i32, %c0_i32_0, %c0_i32_1 : i32, i32, i32
  }
  func.func @transform_2(%arg0: i32) -> (i32, i32) {
    %c0_i32 = arith.constant 0 : i32
    %c0_i32_0 = arith.constant 0 : i32
    %c0_i32_1 = arith.constant 0 : i32
    return %c0_i32, %c0_i32_0 : i32, i32
  }
  func.func @transform_3(%arg0: i32) -> (i32, i32, i32, i32) {
    %c0_i32 = arith.constant 0 : i32
    %c0_i32_0 = arith.constant 0 : i32
    %c0_i32_1 = arith.constant 0 : i32
    %c0_i32_2 = arith.constant 0 : i32
    return %arg0, %c0_i32, %c0_i32_0, %c0_i32_1 : i32, i32, i32, i32
  }
  func.func @transform_4(%arg0: i32) -> (i32, i32, i32) {
    %c0_i32 = arith.constant 0 : i32
    %c0_i32_0 = arith.constant 0 : i32
    %c0_i32_1 = arith.constant 0 : i32
    return %arg0, %c0_i32, %c0_i32_0 : i32, i32, i32
  }
  func.func @transform_5(%arg0: i32) -> (i32, i32, i32, i32) {
    %c0_i32 = arith.constant 0 : i32
    %c0_i32_0 = arith.constant 0 : i32
    %c0_i32_1 = arith.constant 0 : i32
    %c0_i32_2 = arith.constant 0 : i32
    return %arg0, %c0_i32, %c0_i32_0, %c0_i32_1 : i32, i32, i32, i32
  }
}

</mosaic_0001>

<bundles_post_ra>
// kernel: tpu_custom_call.1
= control target key start
LH: loop header
LB: loop body
LE: loop exit
PB: predicated region body
PF: predicated region fallthrough
CT: control target
= control target key end

     0   :  { %11 = vsyncpa [#allocation3], 0  ;;  %s4687_s0 = inlined_call_operand.vmem [shape: f32[2,18,18,4], index: 0, kind: input, shape index: {}]   ;;  %s4688_s1 = inlined_call_operand.vmem [shape: f32[9,4,16], index: 1, kind: input, shape index: {}]   ;;  %s4689_s2 = inlined_call_operand.vmem [shape: f32[1,8], index: 2, kind: input, shape index: {}]   ;;  %s4690_s3 = inlined_call_operand.vmem [shape: f32[2,16,16,8], index: 3, kind: output, shape index: {0}]   ;;  %s4691_s4 = inlined_call_operand.hbm [shape: f32[2,2,8], index: 4, kind: output, shape index: {1}]   ;;  %s4692_s5 = inlined_call_operand.vmem [shape: f32[2,16,16,8], index: 5, kind: output, shape index: {2}]  }
   0x1   :  { %13 = vsyncpa [#allocation3 + $0x1], 0  ;;  %s3074_s18 = smov 0   ;;  %s3076_s19 = smov 0  }
   0x2   :  { %s3078_s20 = smov 0   ;;  %s3080_s21 = smov 0  }
   0x3 LB: > { %s3095_s22 = sadd.s32 4294967295, %s3040_s21   ;;  %s2587_s23 = sadd.s32 4294967294, %s3040_s21   ;;  %s3040_s21 = sphi %s3080_s21, %s4911_s21   ;;  %s3036_s20 = sphi %s3078_s20, %s4910_s20   ;;  %s3032_s19 = sphi %s3076_s19, %s4909_s19   ;;  %s3028_s18 = sphi %s3074_s18, %s4908_s18  }
   0x4   : > { %s3099_s24 = sadd.s32 1, %s3040_s21   ;;  %s120_s25 = sadd.s32 1, %s3036_s20 }
   0x5   : > { %s117_s26 = ssub.s32 %s3040_s21, %s3099_s24  ;;  %p130_p0 = scmp.ne.s32.totalorder %s3036_s20, %s3032_s19 }
   0x6   : > { %p118_p1 = scmp.eq.s32.totalorder %s117_s26, 0  ;;  %p131_p2 = scmp.eq.s32.totalorder %s3095_s22, 1 }
   0x7   : > { %p136_p3 = scmp.ne.s32.totalorder %s3032_s19, %s3028_s18  ;;  %p137_p4 = scmp.eq.s32.totalorder %s2587_s23, 1 }
   0x8   : > { %s3110_s27 = scalar_select %p118_p1, %s3036_s20, %s120_s25  }
   0x9   : > { %p3112_p5 = por %p131_p2, %p130_p0  ;;  %p3116_p6 = por %p137_p4, %p136_p3 }
   0xa   : > { %p2590_p7 = scmp.ge.s32.totalorder %s3040_s21, 1  ;;  %p195_p8 = scmp.lt.s32.totalorder %s3040_s21, 3 }
   0xc   : > { %p196_p9 = pnand %p2590_p7, %p195_p8 }
   0xe   : > { %199 = sbr.rel (%p196_p9) target bundleno = 847 (0x34f), region = 32 }
  0x13   : > { %v2597_v0 = vld [vmem:[%s4688_s1 + $0x4] sm:$0xf]  ;;  %vm499_vm0 = vcmask 1043456   ;;  %p233_p10 = scmp.lt.s32.totalorder %s3095_s22, 1  ;;  %v2664_v1 = vld [vmem:[%s4688_s1 + $0x8] sm:$0xf] }
  0x14   : > { %2908 = vmatpush.msk.msra.mxu1 %vm499_vm0, %v2597_v0  ;;  %2909 = vmatpush.msk.msra.mxu2 %vm499_vm0, %v2597_v0  ;;  %v2698_v2 = vld [vmem:[%s4688_s1 + $0xc] sm:$0xf]  ;;  %v302_v3 = vld [vmem:[%s4688_s1] sm:$0xf]  ;;  %v2732_v4 = vld [vmem:[%s4688_s1 + $0x10] sm:$0xf] }
  0x15   : > { %s3138_s13 = scalar_select %p233_p10, %s3095_s22, 1  ;;  %2910 = vmatpush.msk.msra.mxu3 %vm499_vm0, %v2597_v0  ;;  %2598 = vmatpush.msk.msra.mxu0 %vm499_vm0, %v2597_v0  ;;  %vm351_vm1 = vcmask 1046528   ;;  %vm434_vm2 = vcmask 31744   ;;  %vm796_vm3 = vcmask 1045504   ;;  %vm2041_vm4 = vcmask 64512  }
  0x16   : > { %2665 = vmatpush.msk.msrb.mxu2 %vm499_vm0, %v2664_v1  ;;  %2631 = vmatpush.msk.msrb.mxu1 %vm499_vm0, %v302_v3  ;;  %s3042_s15 = smov 8   ;;  %s3043_s30 = smov 120   ;;  %vm2244_vm5 = vcmask 1040384   ;;  %vm2246_vm6 = vcmask 58368  }
  0x17   : > { %2699 = vmatpush.msk.msrb.mxu3 %vm499_vm0, %v2698_v2  ;;  %s2911_s16 = smul.u32 432, %s3138_s13  ;;  %2733 = vmatpush.msk.msrb.mxu0 %vm499_vm0, %v2732_v4  ;;  %s2903_s8 = sshll.u32 %s3095_s22, 1 }
  0x18   : > { %s2470_s12 = scalar_lea.hbm %s4691_s4, %s2903_s8 }
  0x19   : > { %s3153_s25 = scalar_lea.vmem %s4687_s0, %s2911_s16  ;;  %s2906_s16 = sshll.u32 %s3138_s13, 8 }
  0x1a   : > { %v3156_v5 = vld [vmem:[%s3153_s25 + $0x60] sm:$0xff]  ;;  %v3159_v6 = vld [vmem:[%s3153_s25 + $0x68] sm:$0xff]  ;;  %v3180_v17 = vld [vmem:[%s3153_s25 + $0x70] sm:$0x3]  ;;  %s4235_s26 = scalar_lea.vmem %s4690_s3, %s2906_s16  ;;  %s4471_s7 = scalar_lea.vmem %s4692_s5, %s2906_s16 }
  0x1b   : > { %v3162_v7 = vld [vmem:[%s3153_s25 + $0xc0] sm:$0xff]  ;;  %v372_v8 = vrot.slane %v3156_v5, 1  ;;  %v373_v9 = vrot.slane %v3159_v6, 1  ;;  %v3167_v10 = vld [vmem:[%s3153_s25 + $0xc8] sm:$0xff]  ;;  %v3189_v20 = vld [vmem:[%s3153_s25 + $0xd0] sm:$0x3] }
  0x1c   : > { %v392_v11 = vrot.slane %v3162_v7, 1  ;;  %v3171_v12 = vld [vmem:[%s3153_s25 + $0x120] sm:$0xff]  ;;  %v3174_v13 = vld [vmem:[%s3153_s25 + $0x128] sm:$0xff]  ;;  %v393_v14 = vrot.slane %v3167_v10, 1  ;;  %v3205_v26 = vld [vmem:[%s3153_s25 + $0x130] sm:$0x3] }
  0x1d   : > { %4770 = vst [vmem:[#allocation5_spill] sm:$0xff] %v3171_v12  ;;  %v412_v15 = vrot.slane %v3171_v12, 1  ;;  %v413_v16 = vrot.slane %v3174_v13, 1  ;;  %v3183_v18 = vld [vmem:[%s3153_s25] sm:$0xff]  ;;  %v3186_v19 = vsel %vm351_vm1, %v372_v8, %v373_v9  ;;  %v3192_v21 = vld [vmem:[%s3153_s25 + $0x8] sm:$0xff]  ;;  %v375_v27 = vrot.slane %v3180_v17, 1 }
  0x1e   : > { %4771 = vst [vmem:[#allocation6_spill] sm:$0xff] %v3174_v13  ;;  %v352_v22 = vrot.slane %v3183_v18, 1  ;;  %2607 = vmatmul.msk.f32.vlgmr.msra.gmra.mxu1 %vm434_vm2, %v3186_v19  ;;  %v3198_v23 = vsel %vm351_vm1, %v392_v11, %v393_v14  ;;  %v353_v25 = vrot.slane %v3192_v21, 1  ;;  %v3213_v28 = vld [vmem:[%s3153_s25 + $0x10] sm:$0x3]  ;;  %v395_v29 = vrot.slane %v3189_v20, 1 }
  0x1f   : > { %4772 = vst [vmem:[#allocation7_spill] sm:$0xff] %v3198_v23  ;;  %v3201_v24 = vsel %vm351_vm1, %v412_v15, %v413_v16  ;;  %2615 = vmatmul.msk.f32.vlgmr.msra.gmra.mxu2 %vm434_vm2, %v3198_v23  ;;  %v415_v31 = vrot.slane %v3205_v26, 1  ;;  %v355_v32 = vrot.slane %v3213_v28, 1  ;;  %v3221_v33 = vsel %vm351_vm1, %v373_v9, %v375_v27  ;;  %v3230_v36 = vld [vmem:[%s3153_s25 + $0x78] sm:$0xff]  ;;  %v3233_v37 = vld [vmem:[%s3153_s25 + $0x80] sm:$0xff]  ;;  %v3315_v4 = vld [vmem:[%s3153_s25 + $0x90] sm:$0xff] }
  0x20   : > { %4773 = vst [vmem:[#allocation8_spill] sm:$0xff] %v3201_v24  ;;  %2623 = vmatmul.msk.f32.vlgmr.msra.gmra.mxu3 %vm434_vm2, %v3201_v24  ;;  %v354_v30 = vsel %vm351_vm1, %v352_v22, %v353_v25  ;;  %v3224_v34 = vsel %vm351_vm1, %v393_v14, %v395_v29  ;;  %v3236_v38 = vld [vmem:[%s3153_s25 + $0xd8] sm:$0xff]  ;;  %v3239_v39 = vld [vmem:[%s3153_s25 + $0xe0] sm:$0xff]  ;;  %v377_v43 = vrot.slane %v3230_v36, 1  ;;  %v378_v44 = vrot.slane %v3233_v37, 1  ;;  %v3321_v9 = vld [vmem:[%s3153_s25 + $0xf0] sm:$0xff] }
  0x21   : > { %4774 = vst [vmem:[#allocation9_spill] sm:$0xff] %v3205_v26  ;;  %2599 = vmatmul.msk.f32.vlgmr.msra.gmra.mxu0 %vm434_vm2, %v354_v30  ;;  %v3227_v35 = vsel %vm351_vm1, %v413_v16, %v415_v31  ;;  %v3242_v40 = vld [vmem:[%s3153_s25 + $0x138] sm:$0xff]  ;;  %v3245_v41 = vld [vmem:[%s3153_s25 + $0x140] sm:$0xff]  ;;  %v356_v42 = vsel %vm351_vm1, %v353_v25, %v355_v32  ;;  %v397_v47 = vrot.slane %v3236_v38, 1  ;;  %v398_v48 = vrot.slane %v3239_v39, 1  ;;  %v3327_v14 = vld [vmem:[%s3153_s25 + $0x150] sm:$0xff] }
  0x22   : > { %4775 = vst [vmem:[#allocation10_spill] sm:$0xff] %v3221_v33  ;;  %v3257_v45 = vld [vmem:[%s3153_s25 + $0x18] sm:$0xff]  ;;  %v3260_v46 = vld [vmem:[%s3153_s25 + $0x20] sm:$0xff]  ;;  %v417_v49 = vrot.slane %v3242_v40, 1  ;;  %v418_v50 = vrot.slane %v3245_v41, 1  ;;  %v3270_v53 = vsel %vm351_vm1, %v377_v43, %v378_v44  ;;  %v382_v22 = vrot.slane %v3315_v4, 1 }
  0x23   : > { %4776 = vst [vmem:[#allocation11_spill] sm:$0xff] %v3224_v34  ;;  %v357_v51 = vrot.slane %v3257_v45, 1  ;;  %v358_v52 = vrot.slane %v3260_v46, 1  ;;  %v3273_v54 = vsel %vm351_vm1, %v397_v47, %v398_v48  ;;  %v3279_v56 = vld [vmem:[%s3153_s25 + $0x88] sm:$0x3]  ;;  %v3318_v8 = vld [vmem:[%s3153_s25 + $0x98] sm:$0xff] }
  0x24   : > { %4777 = vst [vmem:[#allocation12_spill] sm:$0xff] %v3227_v35  ;;  %v3276_v55 = vsel %vm351_vm1, %v417_v49, %v418_v50  ;;  %v3282_v57 = vld [vmem:[%s3153_s25 + $0xe8] sm:$0x3]  ;;  %v380_v60 = vrot.slane %v3279_v56, 1  ;;  %v3324_v11 = vld [vmem:[%s3153_s25 + $0xf8] sm:$0xff]  ;;  %v383_v25 = vrot.slane %v3318_v8, 1 }
  0x25   : > { %4778 = vst [vmem:[#allocation13_spill] sm:$0xff] %v3242_v40  ;;  %v3285_v58 = vld [vmem:[%s3153_s25 + $0x148] sm:$0x3]  ;;  %v3290_v59 = vsel %vm351_vm1, %v357_v51, %v358_v52  ;;  %v400_v62 = vrot.slane %v3282_v57, 1  ;;  %v3330_v15 = vld [vmem:[%s3153_s25 + $0x158] sm:$0xff]  ;;  %v3344_v27 = vld [vmem:[%s3153_s25 + $0x30] sm:$0xff] }
  0x26   : > { %4779 = vst [vmem:[#allocation14_spill] sm:$0xff] %v3245_v41  ;;  %2608 = vmatmul.msk.f32.gmra.mxu1 %vm434_vm2, %v3221_v33  ;;  %v3298_v61 = vld [vmem:[%s3153_s25 + $0x28] sm:$0x3]  ;;  %v420_v63 = vrot.slane %v3285_v58, 1  ;;  %v3306_v1 = vsel %vm351_vm1, %v378_v44, %v380_v60  ;;  %v3347_v29 = vld [vmem:[%s3153_s25 + $0x38] sm:$0xff]  ;;  %v402_v30 = vrot.slane %v3321_v9, 1  ;;  %v3358_v47 = vsel %vm351_vm1, %v382_v22, %v383_v25 }
  0x27   : > { %2616 = vmatmul.msk.f32.gmra.mxu2 %vm434_vm2, %v3224_v34  ;;  %4780 = vst [vmem:[#allocation15_spill] sm:$0xff] %v3270_v53  ;;  %v360_v0 = vrot.slane %v3298_v61, 1  ;;  %v3309_v2 = vsel %vm351_vm1, %v398_v48, %v400_v62  ;;  %v403_v31 = vrot.slane %v3324_v11, 1  ;;  %v422_v32 = vrot.slane %v3327_v14, 1  ;;  %v3361_v48 = vld [vmem:[%s3153_s25 + $0xa0] sm:$0x3] }
  0x28   : > { %2624 = vmatmul.msk.f32.gmra.mxu3 %vm434_vm2, %v3227_v35  ;;  %4781 = vst [vmem:[#allocation16_spill] sm:$0xff] %v3276_v55  ;;  %v3312_v3 = vsel %vm351_vm1, %v418_v50, %v420_v63  ;;  %v362_v43 = vrot.slane %v3344_v27, 1  ;;  %v363_v44 = vrot.slane %v3347_v29, 1  ;;  %v3370_v51 = vld [vmem:[%s3153_s25 + $0x100] sm:$0x3]  ;;  %v385_v60 = vrot.slane %v3361_v48, 1 }
  0x29   : > { %2600 = vmatmul.msk.f32.gmra.mxu0 %vm434_vm2, %v356_v42  ;;  %4782 = vst [vmem:[#allocation17_spill] sm:$0xff] %v3285_v58  ;;  %v3335_v16 = vsel %vm351_vm1, %v358_v52, %v360_v0  ;;  %v423_v42 = vrot.slane %v3330_v15, 1  ;;  %v3364_v49 = vsel %vm351_vm1, %v402_v30, %v403_v31  ;;  %v3373_v52 = vld [vmem:[%s3153_s25 + $0x160] sm:$0x3]  ;;  %v2800_v0 = vld [vmem:[%s4688_s1 + $0x18] sm:$0xf] }
  0x2a   : > { %4783 = vst [vmem:[#allocation18_spill] sm:$0xff] %v3306_v1  ;;  %v3379_v62 = vsel %vm351_vm1, %v362_v43, %v363_v44  ;;  %v3382_v63 = vld [vmem:[%s3153_s25 + $0x40] sm:$0x3]  ;;  %v2834_v22 = vld [vmem:[%s4688_s1 + $0x1c] sm:$0xf]  ;;  %v425_v43 = vrot.slane %v3373_v52, 1  ;;  %2801 = vmatpush.msk.msra.mxu2 %vm499_vm0, %v2800_v0 }
  0x2b   : > { %4784 = vst [vmem:[#allocation19_spill] sm:$0xff] %v3312_v3  ;;  %v3367_v50 = vsel %vm351_vm1, %v422_v32, %v423_v42  ;;  %v2766_v30 = vld [vmem:[%s4688_s1 + $0x14] sm:$0xf]  ;;  %v405_v32 = vrot.slane %v3370_v51, 1  ;;  %2835 = vmatpush.msk.msra.mxu3 %vm499_vm0, %v2834_v22  ;;  %v3415_v0 = vld [vmem:[%s3153_s25 + $0xa8] sm:$0xff]  ;;  %s223_s13 = sand.u32 1, %s3032_s19  }
  0x2c   : > { %4785 = vst [vmem:[#allocation20_spill] sm:$0xff] %v3327_v14  ;;  %2767 = vmatpush.msk.msra.mxu1 %vm499_vm0, %v2766_v30  ;;  %v3418_v22 = vld [vmem:[%s3153_s25 + $0xb0] sm:$0xff]  ;;  %v3421_v14 = vld [vmem:[%s3153_s25 + $0x108] sm:$0xff]  ;;  %v3474_v24 = vld [vmem:[%s3153_s25 + $0x118] sm:$0x3]  ;;  %s2591_s9 = sshll.u32 %s223_s13, 1 }
  0x2d   : > { %4786 = vst [vmem:[#allocation21_spill] sm:$0xff] %v3330_v15  ;;  %v365_v15 = vrot.slane %v3382_v63, 1  ;;  %v3409_v58 = vsel %vm351_vm1, %v403_v31, %v405_v32  ;;  %v3424_v30 = vld [vmem:[%s3153_s25 + $0x110] sm:$0xff]  ;;  %v387_v31 = vrot.slane %v3415_v0, 1  ;;  %s225_s14 = scalar_lea.vmem [#allocation2], %s2591_s9  ;;  %s2474_s16 = sshll.u32 %s2470_s12, 4  ;;  %s2475_s16 = int_to_ptr.hbm [resolvable:$true] %s2474_s16 }
  0x2e   : > { %2609 = vmatmul.msk.f32.gmra.mxu1 %vm434_vm2, %v3270_v53  ;;  %4787 = vst [vmem:[#allocation22_spill] sm:$0xff] %v3358_v47  ;;  %v3430_v41 = vld [vmem:[%s3153_s25 + $0x170] sm:$0xff]  ;;  %s2452_s22 = scalar_lea.sflag [#allocation3], %s223_s13  ;;  %s2992_s17 = sshra.s32 %s2475_s16, 4  ;;  %s2993_s17 = int_to_ptr.hbm [resolvable:$true] %s2992_s17 }
  0x2f   : > { %2617 = vmatmul.msk.f32.gmra.mxu2 %vm434_vm2, %v3273_v54  ;;  %4788 = vst [vmem:[#allocation23_spill] sm:$0xff] %v3367_v50  ;;  %v3447_v32 = vld [vmem:[%s3153_s25 + $0x50] sm:$0xff]  ;;  %s2994_s23 = scalar_lea.hbm %s2993_s17, 2  ;;  %p2999_p0 = scmp.lt.s32.totalorder %s2993_s17, %s4691_s4 }
  0x30   : > { %2625 = vmatmul.msk.f32.gmra.mxu3 %vm434_vm2, %v3276_v55  ;;  %4789 = vst [vmem:[#allocation24_spill] sm:$0xff] %v3370_v51  ;;  %v428_v55 = vrot.slane %v3430_v41, 1  ;;  %v368_v40 = vrot.slane %v3447_v32, 1  ;;  %p2995_p11 = scmp.ne.s32.totalorder %s2993_s17, %s2994_s23 }
  0x31   : > { %2601 = vmatmul.msk.f32.gmra.mxu0 %vm434_vm2, %v3290_v59  ;;  %4790 = vst [vmem:[#allocation25_spill] sm:$0xff] %v3373_v52  ;;  %v3412_v52 = vsel %vm351_vm1, %v423_v42, %v425_v43  ;;  %v388_v42 = vrot.slane %v3418_v22, 1  ;;  %v408_v43 = vrot.slane %v3424_v30, 1 }
  0x32   : > { %4792 = vst [vmem:[#allocation27_spill] sm:$0xff] %v3412_v52  ;;  %p2996_p12 = pnand %p2995_p11, %p3112_p5 }
  0x33   : > { %4793 = vst [vmem:[#allocation28_spill] sm:$0xff] %v3424_v30  ;;  %v3462_v35 = vsel %vm351_vm1, %v387_v31, %v388_v42  ;;  %v3490_v31 = vld [vmem:[%s3153_s25 + $0x58] sm:$0x3] }
  0x34   : > { %4795 = vst [vmem:[#allocation30_spill] sm:$0xff] %v3430_v41  ;;  %v3471_v41 = vld [vmem:[%s3153_s25 + $0xb8] sm:$0x3]  ;;  %p2997_p13 = pneg %p2996_p12 }
  0x35   : > { %4796 = vst [vmem:[#allocation31_spill] sm:$0xff] %v3462_v35 }
  0x36   : > { %2610 = vmatmul.msk.f32.gmra.mxu1 %vm434_vm2, %v3306_v1  ;;  %4799 = vst [vmem:[#allocation34_spill] sm:$0xff] %v3474_v24 }
  0x37   : > { %2618 = vmatmul.msk.f32.gmra.mxu2 %vm434_vm2, %v3309_v2 }
  0x38   : > { %2626 = vmatmul.msk.f32.gmra.mxu3 %vm434_vm2, %v3312_v3  ;;  %v3427_v3 = vld [vmem:[%s3153_s25 + $0x168] sm:$0xff] }
  0x39   : > { %2602 = vmatmul.msk.f32.gmra.mxu0 %vm434_vm2, %v3335_v16  ;;  %4794 = vst [vmem:[#allocation29_spill] sm:$0xff] %v3427_v3 }
  0x3e   : > { %2611 = vmatmul.msk.f32.gmra.mxu1 %vm434_vm2, %v3358_v47 }
  0x3f   : > { %2619 = vmatmul.msk.f32.gmra.mxu2 %vm434_vm2, %v3364_v49 }
  0x40   : > { %2627 = vmatmul.msk.f32.gmra.mxu3 %vm434_vm2, %v3367_v50  ;;  %v3406_v50 = vsel %vm351_vm1, %v383_v25, %v385_v60  ;;  %v3435_v25 = vsel %vm351_vm1, %v363_v44, %v365_v15  ;;  %v3444_v60 = vld [vmem:[%s3153_s25 + $0x48] sm:$0xff]  ;;  %v2868_v15 = vld [vmem:[%s4688_s1 + $0x20] sm:$0xf]  ;;  %v407_v44 = vrot.slane %v3421_v14, 1 }
  0x41   : > { %2603 = vmatmul.msk.f32.gmra.mxu0 %vm434_vm2, %v3379_v62  ;;  %4791 = vst [vmem:[#allocation26_spill] sm:$0xff] %v3406_v50  ;;  %v367_v26 = vrot.slane %v3444_v60, 1 }
  0x42   : > { %2869 = vmatpush.msk.msra.mxu0 %vm499_vm0, %v2868_v15  ;;  %v3465_v13 = vsel %vm351_vm1, %v407_v44, %v408_v43  ;;  %v3477_v15 = vld [vmem:[%s3153_s25 + $0x178] sm:$0x3]  ;;  %v410_v44 = vrot.slane %v3474_v24, 1 }
  0x43   : > { %4797 = vst [vmem:[#allocation32_spill] sm:$0xff] %v3465_v13  ;;  %v3482_v12 = vsel %vm351_vm1, %v367_v26, %v368_v40  ;;  %v430_v30 = vrot.slane %v3477_v15, 1  ;;  %v370_v26 = vrot.slane %v3490_v31, 1 }
  0x45   : > { %v3509_v24 = vsel %vm351_vm1, %v368_v40, %v370_v26  ;;  %v800_v40 = vrot.slane %v3213_v28, 2  ;;  %v812_v26 = vrot.slane %v3444_v60, 2 }
  0x46   : > { %2612 = vmatmul.msk.f32.gmra.mxu1 %vm434_vm2, %v3406_v50 }
  0x47   : > { %2620 = vmatmul.msk.f32.gmra.mxu2 %vm434_vm2, %v3409_v58 }
  0x48   : > { %2628 = vmatmul.msk.f32.gmra.mxu3 %vm434_vm2, %v3412_v52  ;;  %v427_v52 = vrot.slane %v3427_v3, 1 }
  0x49   : > { %2604 = vmatmul.msk.f32.gmra.mxu0 %vm434_vm2, %v3435_v25 }
  0x4a   : > { %v3468_v3 = vsel %vm351_vm1, %v427_v52, %v428_v55  ;;  %v390_v52 = vrot.slane %v3471_v41, 1 }
  0x4b   : > { %4798 = vst [vmem:[#allocation33_spill] sm:$0xff] %v3468_v3 }
  0x4c   : > { %v3498_v51 = vsel %vm351_vm1, %v388_v42, %v390_v52  ;;  %v797_v42 = vrot.slane %v3183_v18, 2  ;;  %v803_v52 = vrot.slane %v3260_v46, 2 }
  0x4d   : > { %4800 = vst [vmem:[#allocation35_spill] sm:$0xff] %v3498_v51 }
  0x4e   : > { %2613 = vmatmul.msk.f32.gmra.mxu1 %vm434_vm2, %v3462_v35 }
  0x4f   : > { %2621 = vmatmul.msk.f32.gmra.mxu2 %vm434_vm2, %v3465_v13  ;;  %v3501_v13 = vsel %vm351_vm1, %v408_v43, %v410_v44  ;;  %v798_v43 = vrot.slane %v3192_v21, 2 }
  0x50   : > { %2629 = vmatmul.msk.f32.gmra.mxu3 %vm434_vm2, %v3468_v3  ;;  %v3504_v3 = vsel %vm351_vm1, %v428_v55, %v430_v30 }
  0x51   : > { %2605 = vmatmul.msk.f32.gmra.mxu0 %vm434_vm2, %v3482_v12  ;;  %4801 = vst [vmem:[#allocation36_spill] sm:$0xff] %v3504_v3  ;;  %v799_v55 = vsel %vm796_vm3, %v797_v42, %v798_v43  ;;  %v801_v30 = vsel %vm796_vm3, %v798_v43, %v800_v40  ;;  %v813_v42 = vrot.slane %v3447_v32, 2  ;;  %v815_v43 = vrot.slane %v3490_v31, 2 }
  0x52   : > { %v817_v40 = vrot.slane %v3156_v5, 2 }
  0x56   : > { %2614 = vmatmul.msk.f32.gmra.mxu1 %vm434_vm2, %v3498_v51 }
  0x57   : > { %2622 = vmatmul.msk.f32.gmra.mxu2 %vm434_vm2, %v3501_v13 }
  0x58   : > { %2630 = vmatmul.msk.f32.gmra.mxu3 %vm434_vm2, %v3504_v3 }
  0x59   : > { %2606 = vmatmul.msk.f32.gmra.mxu0 %vm434_vm2, %v3509_v24 }
  0x5e   : > { %2632 = vmatmul.msk.f32.vlgmr.msrb.gmra.mxu1 %vm434_vm2, %v3183_v18  ;;  %v802_v18 = vrot.slane %v3257_v45, 2 }
  0x5f   : > { %2666 = vmatmul.msk.f32.vlgmr.msrb.gmra.mxu2 %vm434_vm2, %v799_v55  ;;  %v3601_v55 = vsel %vm796_vm3, %v813_v42, %v815_v43 }
  0x60   : > { %2700 = vmatmul.msk.f32.vlgmr.msrb.gmra.mxu3 %vm434_vm2, %v3257_v45  ;;  %v3539_v28 = vsel %vm796_vm3, %v802_v18, %v803_v52 }
  0x61   : > { %2734 = vmatmul.msk.f32.vlgmr.msrb.gmra.mxu0 %vm434_vm2, %v3290_v59 }
  0x66   : > { %2633 = vmatmul.msk.f32.gmra.mxu1 %vm434_vm2, %v3192_v21  ;;  %v805_v21 = vrot.slane %v3298_v61, 2 }
  0x67   : > { %2667 = vmatmul.msk.f32.gmra.mxu2 %vm434_vm2, %v801_v30  ;;  %v818_v30 = vrot.slane %v3159_v6, 2 }
  0x68   : > { %2701 = vmatmul.msk.f32.gmra.mxu3 %vm434_vm2, %v3260_v46  ;;  %v3551_v59 = vsel %vm796_vm3, %v803_v52, %v805_v21  ;;  %v820_v21 = vrot.slane %v3180_v17, 2  ;;  %v822_v17 = vrot.slane %v3230_v36, 2 }
  0x69   : > { %2735 = vmatmul.msk.f32.gmra.mxu0 %vm434_vm2, %v3335_v16  ;;  %v808_v16 = vrot.slane %v3347_v29, 2  ;;  %v3616_v18 = vsel %vm796_vm3, %v817_v40, %v818_v30 }
  0x6a   : > { %4802 = vst [vmem:[#allocation37_spill] sm:$0xff] %v3616_v18 }
  0x6e   : > { %2634 = vmatmul.msk.f32.gmra.mxu1 %vm434_vm2, %v3257_v45  ;;  %v807_v45 = vrot.slane %v3344_v27, 2 }
  0x6f   : > { %2668 = vmatmul.msk.f32.gmra.mxu2 %vm434_vm2, %v3539_v28 }
  0x70   : > { %2702 = vmatmul.msk.f32.gmra.mxu3 %vm434_vm2, %v3344_v27  ;;  %v3564_v61 = vsel %vm796_vm3, %v807_v45, %v808_v16 }
  0x71   : > { %2736 = vmatmul.msk.f32.gmra.mxu0 %vm434_vm2, %v3379_v62 }
  0x76   : > { %2635 = vmatmul.msk.f32.gmra.mxu1 %vm434_vm2, %v3260_v46  ;;  %v810_v46 = vrot.slane %v3382_v63, 2  ;;  %v3589_v63 = vsel %vm796_vm3, %v812_v26, %v813_v42  ;;  %v823_v42 = vrot.slane %v3233_v37, 2 }
  0x77   : > { %2669 = vmatmul.msk.f32.gmra.mxu2 %vm434_vm2, %v3551_v59 }
  0x78   : > { %2703 = vmatmul.msk.f32.gmra.mxu3 %vm434_vm2, %v3347_v29  ;;  %v3576_v44 = vsel %vm796_vm3, %v808_v16, %v810_v46 }
  0x79   : > { %2737 = vmatmul.msk.f32.gmra.mxu0 %vm434_vm2, %v3435_v25 }
  0x7e   : > { %2636 = vmatmul.msk.f32.gmra.mxu1 %vm434_vm2, %v3344_v27 }
  0x7f   : > { %2670 = vmatmul.msk.f32.gmra.mxu2 %vm434_vm2, %v3564_v61 }
  0x80   : > { %2704 = vmatmul.msk.f32.gmra.mxu3 %vm434_vm2, %v3444_v60 }
  0x81   : > { %2738 = vmatmul.msk.f32.gmra.mxu0 %vm434_vm2, %v3482_v12 }
  0x86   : > { %2637 = vmatmul.msk.f32.gmra.mxu1 %vm434_vm2, %v3347_v29 }
  0x87   : > { %2671 = vmatmul.msk.f32.gmra.mxu2 %vm434_vm2, %v3576_v44 }
  0x88   : > { %2705 = vmatmul.msk.f32.gmra.mxu3 %vm434_vm2, %v3447_v32 }
  0x89   : > { %2739 = vmatmul.msk.f32.gmra.mxu0 %vm434_vm2, %v3509_v24 }
  0x8e   : > { %2638 = vmatmul.msk.f32.gmra.mxu1 %vm434_vm2, %v3444_v60 }
  0x8f   : > { %2672 = vmatmul.msk.f32.gmra.mxu2 %vm434_vm2, %v3589_v63 }
  0x90   : > { %2706 = vmatmul.msk.f32.gmra.mxu3 %vm434_vm2, %v3156_v5 }
  0x91   : > { %2740 = vmatmul.msk.f32.gmra.mxu0 %vm434_vm2, %v3186_v19 }
  0x96   : > { %2639 = vmatmul.msk.f32.gmra.mxu1 %vm434_vm2, %v3447_v32 }
  0x97   : > { %2673 = vmatmul.msk.f32.gmra.mxu2 %vm434_vm2, %v3601_v55 }
  0x98   : > { %2707 = vmatmul.msk.f32.gmra.mxu3 %vm434_vm2, %v3159_v6 }
  0x99   : > { %2741 = vmatmul.msk.f32.gmra.mxu0 %vm434_vm2, %v3221_v33 }
  0x9b   : > { %v3613_v31 = vpop.f32.mrf.mxu1 }
  0x9e   : > { %2640 = vmatmul.msk.f32.gmra.mxu1 %vm434_vm2, %v3156_v5  ;;  %v3620_v52 = vpop.f32.mrf.mxu0  ;;  %v3636_v5 = vsel %vm796_vm3, %v818_v30, %v820_v21  ;;  %v3657_v30 = vsel %vm796_vm3, %v822_v17, %v823_v42 }
  0x9f   : > { %2674 = vmatmul.msk.f32.gmra.mxu2 %vm434_vm2, %v3616_v18  ;;  %4804 = vst [vmem:[#allocation39_spill] sm:$0xff] %v3636_v5 }
  0xa0   : > { %2708 = vmatmul.msk.f32.gmra.mxu3 %vm434_vm2, %v3230_v36  ;;  %4806 = vst [vmem:[#allocation41_spill] sm:$0xff] %v3657_v30 }
  0xa1   : > { %2742 = vmatmul.msk.f32.gmra.mxu0 %vm434_vm2, %v3270_v53 }
  0xa2   : > { %v3629_v45 = vpop.f32.mrf.mxu2 }
  0xa3   : > { %v3631_v16 = vpop.f32.mrf.mxu3  ;;  %v3633_v46 = vpop.f32.mrf.mxu1 }
  0xa4   : > { %4803 = vst [vmem:[#allocation38_spill] sm:$0xff] %v3631_v16  ;;  %v825_v16 = vrot.slane %v3279_v56, 2  ;;  %v827_v56 = vrot.slane %v3315_v4, 2 }
  0xa6   : > { %2641 = vmatmul.msk.f32.gmra.mxu1 %vm434_vm2, %v3159_v6  ;;  %v3640_v26 = vpop.f32.mrf.mxu0 }
  0xa7   : > { %2675 = vmatmul.msk.f32.gmra.mxu2 %vm434_vm2, %v3636_v5 }
  0xa8   : > { %2709 = vmatmul.msk.f32.gmra.mxu3 %vm434_vm2, %v3233_v37 }
  0xa9   : > { %2743 = vmatmul.msk.f32.gmra.mxu0 %vm434_vm2, %v3306_v1 }
  0xaa   : > { %v3650_v43 = vpop.f32.mrf.mxu2 }
  0xab   : > { %v3652_v40 = vpop.f32.mrf.mxu3  ;;  %v3654_v6 = vpop.f32.mrf.mxu1 }
  0xac   : > { %4805 = vst [vmem:[#allocation40_spill] sm:$0xff] %v3652_v40 }
  0xae   : > { %2642 = vmatmul.msk.f32.gmra.mxu1 %vm434_vm2, %v3230_v36  ;;  %v3661_v21 = vpop.f32.mrf.mxu0  ;;  %v3677_v36 = vsel %vm796_vm3, %v823_v42, %v825_v16 }
  0xaf   : > { %2676 = vmatmul.msk.f32.gmra.mxu2 %vm434_vm2, %v3657_v30  ;;  %4808 = vst [vmem:[#allocation43_spill] sm:$0xff] %v3677_v36 }
  0xb0   : > { %2710 = vmatmul.msk.f32.gmra.mxu3 %vm434_vm2, %v3315_v4 }
  0xb1   : > { %2744 = vmatmul.msk.f32.gmra.mxu0 %vm434_vm2, %v3358_v47 }
  0xb2   : > { %v3670_v40 = vpop.f32.mrf.mxu2 }
  0xb3   : > { %v3672_v17 = vpop.f32.mrf.mxu3  ;;  %v3674_v1 = vpop.f32.mrf.mxu1 }
  0xb4   : > { %4807 = vst [vmem:[#allocation42_spill] sm:$0xff] %v3672_v17  ;;  %v828_v17 = vrot.slane %v3318_v8, 2 }
  0xb6   : > { %2643 = vmatmul.msk.f32.gmra.mxu1 %vm434_vm2, %v3233_v37  ;;  %v3681_v30 = vpop.f32.mrf.mxu0  ;;  %v3698_v47 = vsel %vm796_vm3, %v827_v56, %v828_v17 }
  0xb7   : > { %2677 = vmatmul.msk.f32.gmra.mxu2 %vm434_vm2, %v3677_v36  ;;  %4810 = vst [vmem:[#allocation45_spill] sm:$0xff] %v3698_v47 }
  0xb8   : > { %2711 = vmatmul.msk.f32.gmra.mxu3 %vm434_vm2, %v3318_v8 }
  0xb9   : > { %2745 = vmatmul.msk.f32.gmra.mxu0 %vm434_vm2, %v3406_v50  ;;  %v830_v50 = vrot.slane %v3361_v48, 2  ;;  %v832_v48 = vrot.slane %v3415_v0, 2 }
  0xba   : > { %v3691_v16 = vpop.f32.mrf.mxu2 }
  0xbb   : > { %v3693_v42 = vpop.f32.mrf.mxu3  ;;  %v3695_v37 = vpop.f32.mrf.mxu1 }
  0xbc   : > { %4809 = vst [vmem:[#allocation44_spill] sm:$0xff] %v3693_v42 }
  0xbe   : > { %2644 = vmatmul.msk.f32.gmra.mxu1 %vm434_vm2, %v3315_v4  ;;  %v3702_v36 = vpop.f32.mrf.mxu0  ;;  %v3718_v4 = vsel %vm796_vm3, %v828_v17, %v830_v50 }
  0xbf   : > { %2678 = vmatmul.msk.f32.gmra.mxu2 %vm434_vm2, %v3698_v47  ;;  %4812 = vst [vmem:[#allocation47_spill] sm:$0xff] %v3718_v4 }
  0xc0   : > { %2712 = vmatmul.msk.f32.gmra.mxu3 %vm434_vm2, %v3415_v0 }
  0xc1   : > { %2746 = vmatmul.msk.f32.gmra.mxu0 %vm434_vm2, %v3462_v35 }
  0xc2   : > { %v3711_v42 = vpop.f32.mrf.mxu2 }
  0xc3   : > { %v3713_v56 = vpop.f32.mrf.mxu3  ;;  %v3715_v53 = vpop.f32.mrf.mxu1 }
  0xc4   : > { %4811 = vst [vmem:[#allocation46_spill] sm:$0xff] %v3713_v56  ;;  %v833_v56 = vrot.slane %v3418_v22, 2 }
  0xc6   : > { %2645 = vmatmul.msk.f32.gmra.mxu1 %vm434_vm2, %v3318_v8  ;;  %v3722_v47 = vpop.f32.mrf.mxu0  ;;  %v3739_v35 = vsel %vm796_vm3, %v832_v48, %v833_v56 }
  0xc7   : > { %2679 = vmatmul.msk.f32.gmra.mxu2 %vm434_vm2, %v3718_v4  ;;  %4815 = vst [vmem:[#allocation50_spill] sm:$0xff] %v3739_v35 }
  0xc8   : > { %2713 = vmatmul.msk.f32.gmra.mxu3 %vm434_vm2, %v3418_v22 }
  0xc9   : > { %2747 = vmatmul.msk.f32.gmra.mxu0 %vm434_vm2, %v3498_v51  ;;  %v835_v51 = vrot.slane %v3471_v41, 2  ;;  %v837_v41 = vrot.slane %v3162_v7, 2 }
  0xca   : > { %v3732_v50 = vpop.f32.mrf.mxu2 }
  0xcb   : > { %4813 = vst [vmem:[#allocation48_spill] sm:$0xff] %v3732_v50  ;;  %v3734_v17 = vpop.f32.mrf.mxu3  ;;  %v3736_v8 = vpop.f32.mrf.mxu1 }
  0xcc   : > { %4814 = vst [vmem:[#allocation49_spill] sm:$0xff] %v3734_v17 }
  0xce   : > { %2646 = vmatmul.msk.f32.gmra.mxu1 %vm434_vm2, %v3415_v0  ;;  %v3743_v4 = vpop.f32.mrf.mxu0  ;;  %v3759_v0 = vsel %vm796_vm3, %v833_v56, %v835_v51 }
  0xcf   : > { %2680 = vmatmul.msk.f32.gmra.mxu2 %vm434_vm2, %v3739_v35  ;;  %4818 = vst [vmem:[#allocation53_spill] sm:$0xff] %v3759_v0 }
  0xd0   : > { %2714 = vmatmul.msk.f32.gmra.mxu3 %vm434_vm2, %v3162_v7 }
  0xd1   : > { %2748 = vmatmul.msk.f32.gmra.mxu0 %vm434_vm2, %v3198_v23 }
  0xd2   : > { %v3752_v17 = vpop.f32.mrf.mxu2 }
  0xd3   : > { %4816 = vst [vmem:[#allocation51_spill] sm:$0xff] %v3752_v17  ;;  %v3754_v48 = vpop.f32.mrf.mxu3  ;;  %v3756_v5 = vpop.f32.mrf.mxu1 }
  0xd4   : > { %4817 = vst [vmem:[#allocation52_spill] sm:$0xff] %v3754_v48  ;;  %v838_v48 = vrot.slane %v3167_v10, 2 }
  0xd6   : > { %2647 = vmatmul.msk.f32.gmra.mxu1 %vm434_vm2, %v3418_v22  ;;  %v3763_v35 = vpop.f32.mrf.mxu0  ;;  %v3778_v23 = vsel %vm796_vm3, %v837_v41, %v838_v48 }
  0xd7   : > { %2681 = vmatmul.msk.f32.gmra.mxu2 %vm434_vm2, %v3759_v0  ;;  %4821 = vst [vmem:[#allocation56_spill] sm:$0xff] %v3778_v23 }
  0xd8   : > { %2715 = vmatmul.msk.f32.gmra.mxu3 %vm434_vm2, %v3167_v10 }
  0xd9   : > { %2749 = vmatmul.msk.f32.gmra.mxu0 %vm434_vm2, %v3224_v34  ;;  %v840_v34 = vrot.slane %v3189_v20, 2  ;;  %v842_v20 = vrot.slane %v3236_v38, 2 }
  0xda   : > { %v3773_v51 = vpop.f32.mrf.mxu2 }
  0xdb   : > { %4819 = vst [vmem:[#allocation54_spill] sm:$0xff] %v3773_v51  ;;  %v3775_v56 = vpop.f32.mrf.mxu3  ;;  %v700_v22 = vpop.f32.mrf.mxu1 }
  0xdc   : > { %4820 = vst [vmem:[#allocation55_spill] sm:$0xff] %v3775_v56  ;;  %v701_v51 = vadd.f32 %v700_v22, %v3620_v52  ;;  %v843_v52 = vrot.slane %v3239_v39, 2 }
  0xde   : > { %2648 = vmatmul.msk.f32.gmra.mxu1 %vm434_vm2, %v3162_v7  ;;  %v1279_v0 = vpop.f32.mrf.mxu0  ;;  %v3791_v7 = vsel %vm796_vm3, %v838_v48, %v840_v34 }
  0xdf   : > { %2682 = vmatmul.msk.f32.gmra.mxu2 %vm434_vm2, %v3778_v23 }
  0xe0   : > { %2716 = vmatmul.msk.f32.gmra.mxu3 %vm434_vm2, %v3236_v38 }
  0xe1   : > { %2750 = vmatmul.msk.f32.gmra.mxu0 %vm434_vm2, %v3273_v54 }
  0xe2   : > { %v963_v56 = vpop.f32.mrf.mxu2 }
  0xe3   : > { %v1119_v41 = vpop.f32.mrf.mxu3  ;;  %v1059_v17 = vadd.f32 %v963_v56, %v701_v51  ;;  %v703_v50 = vpop.f32.mrf.mxu1 }
  0xe4   : > { %v704_v34 = vadd.f32 %v703_v50, %v3640_v26  ;;  %v845_v26 = vrot.slane %v3282_v57, 2  ;;  %v847_v57 = vrot.slane %v3321_v9, 2 }
  0xe5   : > { %v1215_v33 = vadd.f32 %v1119_v41, %v1059_v17 }
  0xe6   : > { %2649 = vmatmul.msk.f32.gmra.mxu1 %vm434_vm2, %v3167_v10  ;;  %v1282_v23 = vpop.f32.mrf.mxu0 }
  0xe7   : > { %v3795_v18 = vadd.f32 %v1279_v0, %v1215_v33  ;;  %2683 = vmatmul.msk.f32.gmra.mxu2 %vm434_vm2, %v3791_v7  ;;  %v3807_v0 = vsel %vm796_vm3, %v842_v20, %v843_v52 }
  0xe8   : > { %2717 = vmatmul.msk.f32.gmra.mxu3 %vm434_vm2, %v3239_v39 }
  0xe9   : > { %2751 = vmatmul.msk.f32.gmra.mxu0 %vm434_vm2, %v3309_v2 }
  0xea   : > { %v966_v17 = vpop.f32.mrf.mxu2 }
  0xeb   : > { %v1122_v10 = vpop.f32.mrf.mxu3  ;;  %v1060_v48 = vadd.f32 %v966_v17, %v704_v34  ;;  %v706_v33 = vpop.f32.mrf.mxu1 }
  0xec   : > { %v707_v50 = vadd.f32 %v706_v33, %v3661_v21  ;;  %v848_v21 = vrot.slane %v3324_v11, 2 }
  0xed   : > { %v1216_v51 = vadd.f32 %v1122_v10, %v1060_v48 }
  0xee   : > { %2650 = vmatmul.msk.f32.gmra.mxu1 %vm434_vm2, %v3236_v38  ;;  %v1285_v56 = vpop.f32.mrf.mxu0 }
  0xef   : > { %v3811_v22 = vadd.f32 %v1282_v23, %v1216_v51  ;;  %2684 = vmatmul.msk.f32.gmra.mxu2 %vm434_vm2, %v3807_v0  ;;  %v3822_v23 = vsel %vm796_vm3, %v843_v52, %v845_v26  ;;  %v3838_v26 = vsel %vm796_vm3, %v847_v57, %v848_v21 }
  0xf0   : > { %2718 = vmatmul.msk.f32.gmra.mxu3 %vm434_vm2, %v3321_v9 }
  0xf1   : > { %2752 = vmatmul.msk.f32.gmra.mxu0 %vm434_vm2, %v3364_v49 }
  0xf2   : > { %v969_v41 = vpop.f32.mrf.mxu2 }
  0xf3   : > { %v1125_v20 = vpop.f32.mrf.mxu3  ;;  %v1061_v34 = vadd.f32 %v969_v41, %v707_v50  ;;  %v709_v38 = vpop.f32.mrf.mxu1 }
  0xf4   : > { %v710_v52 = vadd.f32 %v709_v38, %v3681_v30  ;;  %v4823_v30 = vld [vmem:[#allocation24_spill] sm:$0xff] }
  0xf5   : > { %v1217_v17 = vadd.f32 %v1125_v20, %v1061_v34  ;;  %v850_v34 = vrot.slane %v4823_v30, 2 }
  0xf6   : > { %2651 = vmatmul.msk.f32.gmra.mxu1 %vm434_vm2, %v3239_v39  ;;  %v1288_v10 = vpop.f32.mrf.mxu0 }
  0xf7   : > { %v3826_v48 = vadd.f32 %v1285_v56, %v1217_v17  ;;  %2685 = vmatmul.msk.f32.gmra.mxu2 %vm434_vm2, %v3822_v23  ;;  %v4824_v17 = vld [vmem:[#allocation32_spill] sm:$0xff] }
  0xf8   : > { %2719 = vmatmul.msk.f32.gmra.mxu3 %vm434_vm2, %v3324_v11 }
  0xf9   : > { %2753 = vmatmul.msk.f32.gmra.mxu0 %vm434_vm2, %v3409_v58 }
  0xfa   : > { %v972_v33 = vpop.f32.mrf.mxu2 }
  0xfb   : > { %v1128_v39 = vpop.f32.mrf.mxu3  ;;  %v1062_v51 = vadd.f32 %v972_v33, %v710_v52  ;;  %v712_v56 = vpop.f32.mrf.mxu1 }
  0xfc   : > { %v713_v38 = vadd.f32 %v712_v56, %v3702_v36  ;;  %v4826_v36 = vld [vmem:[#allocation28_spill] sm:$0xff]  ;;  %v852_v56 = vrot.slane %v3421_v14, 2 }
  0xfd   : > { %v1218_v50 = vadd.f32 %v1128_v39, %v1062_v51  ;;  %v853_v30 = vrot.slane %v4826_v36, 2 }
  0xfe   : > { %2652 = vmatmul.msk.f32.gmra.mxu1 %vm434_vm2, %v3321_v9  ;;  %v1291_v41 = vpop.f32.mrf.mxu0 }
  0xff   : > { %v3842_v20 = vadd.f32 %v1288_v10, %v1218_v50  ;;  %2686 = vmatmul.msk.f32.gmra.mxu2 %vm434_vm2, %v3838_v26  ;;  %v3853_v10 = vsel %vm796_vm3, %v848_v21, %v850_v34 }
 0x100   : > { %2720 = vmatmul.msk.f32.gmra.mxu3 %vm434_vm2, %v3421_v14 }
 0x101   : > { %4822 = vst [vmem:[#allocation57_spill] sm:$0xff] %v3842_v20  ;;  %2754 = vmatmul.msk.f32.gmra.mxu0 %vm434_vm2, %v4824_v17 }
 0x102   : > { %v975_v57 = vpop.f32.mrf.mxu2 }
 0x103   : > { %v1131_v52 = vpop.f32.mrf.mxu3  ;;  %v1063_v33 = vadd.f32 %v975_v57, %v713_v38  ;;  %v715_v9 = vpop.f32.mrf.mxu1  ;;  %v3869_v57 = vsel %vm796_vm3, %v852_v56, %v853_v30 }
 0x104   : > { %v716_v21 = vadd.f32 %v715_v9, %v3722_v47  ;;  %v4828_v47 = vld [vmem:[#allocation5_spill] sm:$0xff]  ;;  %v4829_v9 = vld [vmem:[#allocation34_spill] sm:$0xff] }
 0x105   : > { %v1219_v39 = vadd.f32 %v1131_v52, %v1063_v33 }
 0x106   : > { %2653 = vmatmul.msk.f32.gmra.mxu1 %vm434_vm2, %v3324_v11  ;;  %v1294_v51 = vpop.f32.mrf.mxu0 }
 0x107   : > { %v3857_v50 = vadd.f32 %v1291_v41, %v1219_v39  ;;  %2687 = vmatmul.msk.f32.gmra.mxu2 %vm434_vm2, %v3853_v10 }
 0x108   : > { %2721 = vmatmul.msk.f32.gmra.mxu3 %vm434_vm2, %v4826_v36 }
 0x109   : > { %4825 = vst [vmem:[#allocation24_spill] sm:$0xff] %v3857_v50  ;;  %2755 = vmatmul.msk.f32.gmra.mxu0 %vm434_vm2, %v3501_v13  ;;  %v855_v50 = vrot.slane %v4829_v9, 2 }
 0x10a   : > { %v978_v34 = vpop.f32.mrf.mxu2 }
 0x10b   : > { %v1134_v11 = vpop.f32.mrf.mxu3  ;;  %v1064_v38 = vadd.f32 %v978_v34, %v716_v21  ;;  %v718_v41 = vpop.f32.mrf.mxu1  ;;  %v4830_v34 = vld [vmem:[#allocation8_spill] sm:$0xff] }
 0x10c   : > { %v719_v21 = vadd.f32 %v718_v41, %v3743_v4  ;;  %v4832_v4 = vld [vmem:[#allocation6_spill] sm:$0xff]  ;;  %v857_v41 = vrot.slane %v4828_v47, 2 }
 0x10d   : > { %v1220_v52 = vadd.f32 %v1134_v11, %v1064_v38  ;;  %v858_v9 = vrot.slane %v4832_v4, 2 }
 0x10e   : > { %2654 = vmatmul.msk.f32.gmra.mxu1 %vm434_vm2, %v3421_v14  ;;  %v1297_v33 = vpop.f32.mrf.mxu0 }
 0x10f   : > { %v3873_v39 = vadd.f32 %v1294_v51, %v1220_v52  ;;  %2688 = vmatmul.msk.f32.gmra.mxu2 %vm434_vm2, %v3869_v57  ;;  %v3884_v51 = vsel %vm796_vm3, %v853_v30, %v855_v50  ;;  %v4833_v30 = vld [vmem:[#allocation12_spill] sm:$0xff] }
 0x110   : > { %2722 = vmatmul.msk.f32.gmra.mxu3 %vm434_vm2, %v4828_v47 }
 0x111   : > { %4827 = vst [vmem:[#allocation32_spill] sm:$0xff] %v3873_v39  ;;  %2756 = vmatmul.msk.f32.gmra.mxu0 %vm434_vm2, %v4830_v34 }
 0x112   : > { %v981_v56 = vpop.f32.mrf.mxu2 }
 0x113   : > { %v1137_v11 = vpop.f32.mrf.mxu3  ;;  %v1065_v38 = vadd.f32 %v981_v56, %v719_v21  ;;  %v721_v14 = vpop.f32.mrf.mxu1 }
 0x114   : > { %v722_v50 = vadd.f32 %v721_v14, %v3763_v35  ;;  %v4836_v35 = vld [vmem:[#allocation13_spill] sm:$0xff] }
 0x115   : > { %v1221_v52 = vadd.f32 %v1137_v11, %v1065_v38  ;;  %v3900_v11 = vsel %vm796_vm3, %v857_v41, %v858_v9  ;;  %v4837_v14 = vld [vmem:[#allocation9_spill] sm:$0xff] }
 0x116   : > { %2655 = vmatmul.msk.f32.gmra.mxu1 %vm434_vm2, %v4826_v36  ;;  %v1300_v39 = vpop.f32.mrf.mxu0  ;;  %4834 = vst [vmem:[#allocation5_spill] sm:$0xff] %v3900_v11 }
 0x117   : > { %v3888_v20 = vadd.f32 %v1297_v33, %v1221_v52  ;;  %2689 = vmatmul.msk.f32.gmra.mxu2 %vm434_vm2, %v3884_v51 }
 0x118   : > { %2723 = vmatmul.msk.f32.gmra.mxu3 %vm434_vm2, %v4832_v4 }
 0x119   : > { %4831 = vst [vmem:[#allocation28_spill] sm:$0xff] %v3888_v20  ;;  %2757 = vmatmul.msk.f32.gmra.mxu0 %vm434_vm2, %v4833_v30  ;;  %v860_v30 = vrot.slane %v4837_v14, 2 }
 0x11a   : > { %v984_v21 = vpop.f32.mrf.mxu2 }
 0x11b   : > { %v1140_v36 = vpop.f32.mrf.mxu3  ;;  %v1066_v56 = vadd.f32 %v984_v21, %v722_v50  ;;  %v724_v33 = vpop.f32.mrf.mxu1  ;;  %v4838_v21 = vld [vmem:[#allocation16_spill] sm:$0xff] }
 0x11c   : > { %v725_v50 = vadd.f32 %v724_v33, %v3613_v31  ;;  %v4840_v31 = vld [vmem:[#allocation14_spill] sm:$0xff]  ;;  %v862_v33 = vrot.slane %v4836_v35, 2 }
 0x11d   : > { %v1222_v38 = vadd.f32 %v1140_v36, %v1066_v56  ;;  %v863_v14 = vrot.slane %v4840_v31, 2 }
 0x11e   : > { %2656 = vmatmul.msk.f32.gmra.mxu1 %vm434_vm2, %v4828_v47  ;;  %v1303_v52 = vpop.f32.mrf.mxu0 }
 0x11f   : > { %v3904_v20 = vadd.f32 %v1300_v39, %v1222_v38  ;;  %2690 = vmatmul.msk.f32.gmra.mxu2 %vm434_vm2, %v3900_v11  ;;  %v3915_v39 = vsel %vm796_vm3, %v858_v9, %v860_v30  ;;  %v4841_v30 = vld [vmem:[#allocation19_spill] sm:$0xff] }
 0x120   : > { %2724 = vmatmul.msk.f32.gmra.mxu3 %vm434_vm2, %v4836_v35 }
 0x121   : > { %4835 = vst [vmem:[#allocation34_spill] sm:$0xff] %v3904_v20  ;;  %2758 = vmatmul.msk.f32.gmra.mxu0 %vm434_vm2, %v4838_v21 }
 0x122   : > { %v987_v41 = vpop.f32.mrf.mxu2 }
 0x123   : > { %v1143_v36 = vpop.f32.mrf.mxu3  ;;  %v1067_v56 = vadd.f32 %v987_v41, %v725_v50  ;;  %v727_v47 = vpop.f32.mrf.mxu1 }
 0x124   : > { %v728_v9 = vadd.f32 %v727_v47, %v3633_v46  ;;  %v4844_v46 = vld [vmem:[#allocation20_spill] sm:$0xff]  ;;  %v4845_v47 = vld [vmem:[#allocation17_spill] sm:$0xff] }
 0x125   : > { %v1223_v38 = vadd.f32 %v1143_v36, %v1067_v56  ;;  %v3931_v36 = vsel %vm796_vm3, %v862_v33, %v863_v14 }
 0x126   : > { %2657 = vmatmul.msk.f32.gmra.mxu1 %vm434_vm2, %v4832_v4  ;;  %v1306_v20 = vpop.f32.mrf.mxu0  ;;  %4842 = vst [vmem:[#allocation6_spill] sm:$0xff] %v3931_v36 }
 0x127   : > { %v3919_v11 = vadd.f32 %v1303_v52, %v1223_v38  ;;  %2691 = vmatmul.msk.f32.gmra.mxu2 %vm434_vm2, %v3915_v39 }
 0x128   : > { %2725 = vmatmul.msk.f32.gmra.mxu3 %vm434_vm2, %v4840_v31 }
 0x129   : > { %4839 = vst [vmem:[#allocation8_spill] sm:$0xff] %v3919_v11  ;;  %2759 = vmatmul.msk.f32.gmra.mxu0 %vm434_vm2, %v4841_v30  ;;  %v865_v30 = vrot.slane %v4845_v47, 2 }
 0x12a   : > { %v990_v50 = vpop.f32.mrf.mxu2 }
 0x12b   : > { %v1146_v4 = vpop.f32.mrf.mxu3  ;;  %v1068_v41 = vadd.f32 %v990_v50, %v728_v9  ;;  %v730_v52 = vpop.f32.mrf.mxu1  ;;  %v4846_v50 = vld [vmem:[#allocation23_spill] sm:$0xff] }
 0x12c   : > { %v731_v9 = vadd.f32 %v730_v52, %v3654_v6  ;;  %v4848_v6 = vld [vmem:[#allocation21_spill] sm:$0xff]  ;;  %v867_v52 = vrot.slane %v4844_v46, 2 }
 0x12d   : > { %v1224_v56 = vadd.f32 %v1146_v4, %v1068_v41  ;;  %v868_v47 = vrot.slane %v4848_v6, 2 }
 0x12e   : > { %2658 = vmatmul.msk.f32.gmra.mxu1 %vm434_vm2, %v4836_v35  ;;  %v1309_v38 = vpop.f32.mrf.mxu0 }
 0x12f   : > { %v3935_v11 = vadd.f32 %v1306_v20, %v1224_v56  ;;  %2692 = vmatmul.msk.f32.gmra.mxu2 %vm434_vm2, %v3931_v36  ;;  %v3946_v20 = vsel %vm796_vm3, %v863_v14, %v865_v30  ;;  %v4849_v30 = vld [vmem:[#allocation27_spill] sm:$0xff] }
 0x130   : > { %2726 = vmatmul.msk.f32.gmra.mxu3 %vm434_vm2, %v4844_v46 }
 0x131   : > { %4843 = vst [vmem:[#allocation13_spill] sm:$0xff] %v3935_v11  ;;  %2760 = vmatmul.msk.f32.gmra.mxu0 %vm434_vm2, %v4846_v50 }
 0x132   : > { %v993_v33 = vpop.f32.mrf.mxu2 }
 0x133   : > { %v1149_v4 = vpop.f32.mrf.mxu3  ;;  %v1069_v41 = vadd.f32 %v993_v33, %v731_v9  ;;  %v733_v35 = vpop.f32.mrf.mxu1 }
 0x134   : > { %v734_v14 = vadd.f32 %v733_v35, %v3674_v1  ;;  %v4852_v1 = vld [vmem:[#allocation29_spill] sm:$0xff] }
 0x135   : > { %v1225_v56 = vadd.f32 %v1149_v4, %v1069_v41  ;;  %v3962_v4 = vsel %vm796_vm3, %v867_v52, %v868_v47  ;;  %v4853_v35 = vld [vmem:[#allocation25_spill] sm:$0xff] }
 0x136   : > { %2659 = vmatmul.msk.f32.gmra.mxu1 %vm434_vm2, %v4840_v31  ;;  %v1312_v11 = vpop.f32.mrf.mxu0  ;;  %4850 = vst [vmem:[#allocation16_spill] sm:$0xff] %v3962_v4  ;;  %v4854_v52 = vld [vmem:[#allocation33_spill] sm:$0xff] }
 0x137   : > { %v3950_v36 = vadd.f32 %v1309_v38, %v1225_v56  ;;  %2693 = vmatmul.msk.f32.gmra.mxu2 %vm434_vm2, %v3946_v20 }
 0x138   : > { %2727 = vmatmul.msk.f32.gmra.mxu3 %vm434_vm2, %v4848_v6 }
 0x139   : > { %4847 = vst [vmem:[#allocation9_spill] sm:$0xff] %v3950_v36  ;;  %2761 = vmatmul.msk.f32.gmra.mxu0 %vm434_vm2, %v4849_v30 }
 0x13a   : > { %v996_v9 = vpop.f32.mrf.mxu2 }
 0x13b   : > { %v1152_v31 = vpop.f32.mrf.mxu3  ;;  %v1070_v33 = vadd.f32 %v996_v9, %v734_v14  ;;  %v736_v38 = vpop.f32.mrf.mxu1  ;;  %v870_v14 = vrot.slane %v4853_v35, 2  ;;  %v872_v35 = vrot.slane %v4852_v1, 2 }
 0x13c   : > { %v737_v9 = vadd.f32 %v736_v38, %v3695_v37  ;;  %v4856_v37 = vld [vmem:[#allocation30_spill] sm:$0xff] }
 0x13d   : > { %v1226_v41 = vadd.f32 %v1152_v31, %v1070_v33  ;;  %v3988_v38 = vld [vmem:[%s3153_s25 + $0x188] sm:$0xff] }
 0x13e   : > { %2660 = vmatmul.msk.f32.gmra.mxu1 %vm434_vm2, %v4844_v46  ;;  %v1315_v56 = vpop.f32.mrf.mxu0 }
 0x13f   : > { %v3966_v36 = vadd.f32 %v1312_v11, %v1226_v41  ;;  %2694 = vmatmul.msk.f32.gmra.mxu2 %vm434_vm2, %v3962_v4  ;;  %v3977_v41 = vsel %vm796_vm3, %v868_v47, %v870_v14  ;;  %v873_v47 = vrot.slane %v4856_v37, 2 }
 0x140   : > { %2728 = vmatmul.msk.f32.gmra.mxu3 %vm434_vm2, %v4852_v1 }
 0x141   : > { %4851 = vst [vmem:[#allocation14_spill] sm:$0xff] %v3966_v36  ;;  %2762 = vmatmul.msk.f32.gmra.mxu0 %vm434_vm2, %v4854_v52 }
 0x142   : > { %v999_v31 = vpop.f32.mrf.mxu2 }
 0x143   : > { %v1155_v46 = vpop.f32.mrf.mxu3  ;;  %v1071_v33 = vadd.f32 %v999_v31, %v737_v9  ;;  %v739_v11 = vpop.f32.mrf.mxu1  ;;  %v3994_v9 = vld [vmem:[%s3153_s25 + $0x180] sm:$0xff]  ;;  %v1249_v31 = vrot.slane %v3988_v38, 1 }
 0x144   : > { %v740_v14 = vadd.f32 %v739_v11, %v3715_v53  ;;  %4857 = vst [vmem:[#allocation17_spill] sm:$0xff] %v3994_v9 }
 0x145   : > { %v1227_v36 = vadd.f32 %v1155_v46, %v1071_v33 }
 0x146   : > { %2661 = vmatmul.msk.f32.gmra.mxu1 %vm434_vm2, %v4848_v6  ;;  %v1318_v30 = vpop.f32.mrf.mxu0 }
 0x147   : > { %v3981_v4 = vadd.f32 %v1315_v56, %v1227_v36  ;;  %2695 = vmatmul.msk.f32.gmra.mxu2 %vm434_vm2, %v3977_v41  ;;  %v1248_v56 = vrot.slane %v3994_v9, 1 }
 0x148   : > { %2729 = vmatmul.msk.f32.gmra.mxu3 %vm434_vm2, %v4856_v37 }
 0x149   : > { %4855 = vst [vmem:[#allocation20_spill] sm:$0xff] %v3981_v4  ;;  %2763 = vmatmul.msk.f32.gmra.mxu0 %vm434_vm2, %v3504_v3  ;;  %v4001_v4 = vsel %vm796_vm3, %v872_v35, %v873_v47  ;;  %v4006_v11 = vsel %vm351_vm1, %v1248_v56, %v1249_v31  ;;  %v875_v35 = vrot.slane %v3477_v15, 2 }
 0x14a   : > { %v1002_v36 = vpop.f32.mrf.mxu2 }
 0x14b   : > { %v1158_v6 = vpop.f32.mrf.mxu3  ;;  %v1072_v46 = vadd.f32 %v1002_v36, %v740_v14  ;;  %v742_v33 = vpop.f32.mrf.mxu1  ;;  %v4015_v14 = vld [vmem:[%s3153_s25 + $0x190] sm:$0x3] }
 0x14c   : > { %v743_v36 = vadd.f32 %v742_v33, %v3736_v8 }
 0x14d   : > { %v1228_v52 = vadd.f32 %v1158_v6, %v1072_v46  ;;  %v4023_v46 = vsel %vm796_vm3, %v873_v47, %v875_v35 }
 0x14e   : > { %2662 = vmatmul.msk.f32.gmra.mxu1 %vm434_vm2, %v4852_v1  ;;  %v1321_v53 = vpop.f32.mrf.mxu0 }
 0x14f   : > { %v4008_v3 = vadd.f32 %v1318_v30, %v1228_v52  ;;  %2696 = vmatmul.msk.f32.gmra.mxu2 %vm434_vm2, %v4001_v4  ;;  %v1251_v30 = vrot.slane %v4015_v14, 1 }
 0x150   : > { %2730 = vmatmul.msk.f32.gmra.mxu3 %vm434_vm2, %v3994_v9 }
 0x151   : > { %4858 = vst [vmem:[#allocation23_spill] sm:$0xff] %v4008_v3  ;;  %2764 = vmatmul.msk.f32.gmra.mxu0 %vm434_vm2, %v4006_v11  ;;  %v2953_v3 = vld [vmem:[%s4689_s2] ss:$0 sm:$0xff]  ;;  %v4031_v8 = vsel %vm351_vm1, %v1249_v31, %v1251_v30 }
 0x152   : > { %v1005_v1 = vpop.f32.mrf.mxu2  ;;  %2251 = vrot.lane.b32.xlu0 %v2953_v3, %s3042_s15  ;;  %s2472_s15 = sshll.u32 %s225_s14, 4  ;;  %s2473_s15 = int_to_ptr.vmem [resolvable:$true] %s2472_s15 }
 0x153   : > { %v1161_v6 = vpop.f32.mrf.mxu3  ;;  %v1073_v52 = vadd.f32 %v1005_v1, %v743_v36  ;;  %v745_v56 = vpop.f32.mrf.mxu1 }
 0x154   : > { %v746_v47 = vadd.f32 %v745_v56, %v3756_v5 }
 0x155   : > { %v1229_v9 = vadd.f32 %v1161_v6, %v1073_v52 }
 0x156   : > { %2663 = vmatmul.msk.f32.gmra.mxu1 %vm434_vm2, %v4856_v37  ;;  %v1324_v15 = vpop.f32.mrf.mxu0 }
 0x157   : > { %v4033_v33 = vadd.f32 %v1321_v53, %v1229_v9  ;;  %2697 = vmatmul.msk.f32.gmra.mxu2 %vm434_vm2, %v4023_v46 }
 0x158   : > { %2731 = vmatmul.msk.f32.gmra.mxu3 %vm434_vm2, %v3988_v38 }
 0x159   : > { %2765 = vmatmul.msk.f32.gmra.mxu0 %vm434_vm2, %v4031_v8 }
 0x15a   : > { %v1008_v37 = vpop.f32.mrf.mxu2 }
 0x15b   : > { %v1164_v35 = vpop.f32.mrf.mxu3  ;;  %v1074_v36 = vadd.f32 %v1008_v37, %v746_v47  ;;  %v748_v31 = vpop.f32.mrf.mxu1 }
 0x15c   : > { %v749_v5 = vadd.f32 %v748_v31, %v3629_v45 }
 0x15d   : > { %v1230_v1 = vadd.f32 %v1164_v35, %v1074_v36 }
 0x15e   : > { %2768 = vmatmul.msk.f32.vlgmr.msra.gmra.mxu1 %vm434_vm2, %v3539_v28  ;;  %v1327_v3 = vpop.f32.mrf.mxu0 }
 0x15f   : > { %v4044_v9 = vadd.f32 %v1324_v15, %v1230_v1  ;;  %2802 = vmatmul.msk.f32.vlgmr.msra.gmra.mxu2 %vm434_vm2, %v3344_v27 }
 0x160   : > { %2836 = vmatmul.msk.f32.vlgmr.msra.gmra.mxu3 %vm434_vm2, %v3379_v62 }
 0x161   : > { %2870 = vmatmul.msk.f32.vlgmr.msra.gmra.mxu0 %vm434_vm2, %v3564_v61 }
 0x162   : > { %v1011_v53 = vpop.f32.mrf.mxu2 }
 0x163   : > { %v1167_v6 = vpop.f32.mrf.mxu3  ;;  %v1075_v30 = vadd.f32 %v1011_v53, %v749_v5  ;;  %v751_v52 = vpop.f32.mrf.mxu1 }
 0x164   : > { %v752_v27 = vadd.f32 %v751_v52, %v3650_v43 }
 0x165   : > { %v1231_v56 = vadd.f32 %v1167_v6, %v1075_v30 }
 0x166   : > { %2769 = vmatmul.msk.f32.gmra.mxu1 %vm434_vm2, %v3551_v59  ;;  %v1330_v28 = vpop.f32.mrf.mxu0 }
 0x167   : > { %v4055_v15 = vadd.f32 %v1327_v3, %v1231_v56  ;;  %2803 = vmatmul.msk.f32.gmra.mxu2 %vm434_vm2, %v3347_v29 }
 0x168   : > { %2837 = vmatmul.msk.f32.gmra.mxu3 %vm434_vm2, %v3435_v25 }
 0x169   : > { %2871 = vmatmul.msk.f32.gmra.mxu0 %vm434_vm2, %v3576_v44 }
 0x16a   : > { %v1014_v62 = vpop.f32.mrf.mxu2 }
 0x16b   : > { %v1170_v45 = vpop.f32.mrf.mxu3  ;;  %v1076_v47 = vadd.f32 %v1014_v62, %v752_v27  ;;  %v754_v37 = vpop.f32.mrf.mxu1 }
 0x16c   : > { %v755_v29 = vadd.f32 %v754_v37, %v3670_v40  ;;  %v2955_v37 = vld [vmem:[%s3153_s25 + $0x68] sm:$0xff] }
 0x16d   : > { %v1232_v35 = vadd.f32 %v1170_v45, %v1076_v47 }
 0x16e   : > { %2770 = vmatmul.msk.f32.gmra.mxu1 %vm434_vm2, %v3564_v61  ;;  %v1333_v59 = vpop.f32.mrf.mxu0 }
 0x16f   : > { %v4066_v36 = vadd.f32 %v1330_v28, %v1232_v35  ;;  %2804 = vmatmul.msk.f32.gmra.mxu2 %vm434_vm2, %v3444_v60 }
 0x170   : > { %2838 = vmatmul.msk.f32.gmra.mxu3 %vm434_vm2, %v3482_v12 }
 0x171   : > { %2872 = vmatmul.msk.f32.gmra.mxu0 %vm434_vm2, %v3589_v63 }
 0x172   : > { %v1017_v25 = vpop.f32.mrf.mxu2 }
 0x173   : > { %v1173_v43 = vpop.f32.mrf.mxu3  ;;  %v1077_v31 = vadd.f32 %v1017_v25, %v755_v29  ;;  %v757_v1 = vpop.f32.mrf.mxu1 }
 0x174   : > { %v758_v12 = vadd.f32 %v757_v1, %v3691_v16  ;;  %v4859_v16 = vld [vmem:[#allocation37_spill] sm:$0xff] }
 0x175   : > { %v1233_v3 = vadd.f32 %v1173_v43, %v1077_v31 }
 0x176   : > { %2771 = vmatmul.msk.f32.gmra.mxu1 %vm434_vm2, %v3576_v44  ;;  %v1336_v61 = vpop.f32.mrf.mxu0 }
 0x177   : > { %v4077_v5 = vadd.f32 %v1333_v59, %v1233_v3  ;;  %2805 = vmatmul.msk.f32.gmra.mxu2 %vm434_vm2, %v3447_v32  ;;  %v2954_v32 = vld [vmem:[%s3153_s25 + $0x60] sm:$0xff]  ;;  %v4862_v59 = vld [vmem:[#allocation39_spill] sm:$0xff] }
 0x178   : > { %2839 = vmatmul.msk.f32.gmra.mxu3 %vm434_vm2, %v3509_v24 }
 0x179   : > { %2873 = vmatmul.msk.f32.gmra.mxu0 %vm434_vm2, %v3601_v55 }
 0x17a   : > { %v1020_v60 = vpop.f32.mrf.mxu2 }
 0x17b   : > { %v1176_v40 = vpop.f32.mrf.mxu3  ;;  %v1078_v53 = vadd.f32 %v1020_v60, %v758_v12  ;;  %v760_v6 = vpop.f32.mrf.mxu1  ;;  %v4863_v12 = vld [vmem:[#allocation15_spill] sm:$0xff] }
 0x17c   : > { %v761_v24 = vadd.f32 %v760_v6, %v3711_v42  ;;  %v4861_v42 = vld [vmem:[#allocation48_spill] sm:$0xff]  ;;  %v4864_v60 = vld [vmem:[#allocation51_spill] sm:$0xff] }
 0x17d   : > { %v1234_v30 = vadd.f32 %v1176_v40, %v1078_v53  ;;  %v4865_v53 = vld [vmem:[#allocation41_spill] sm:$0xff] }
 0x17e   : > { %2772 = vmatmul.msk.f32.gmra.mxu1 %vm434_vm2, %v3589_v63  ;;  %v1339_v44 = vpop.f32.mrf.mxu0 }
 0x17f   : > { %v4088_v52 = vadd.f32 %v1336_v61, %v1234_v30  ;;  %2806 = vmatmul.msk.f32.gmra.mxu2 %vm434_vm2, %v2954_v32  ;;  %v2956_v61 = vld [vmem:[%s3153_s25 + $0x78] sm:$0xff] }
 0x180   : > { %2840 = vmatmul.msk.f32.gmra.mxu3 %vm434_vm2, %v3186_v19  ;;  %v4860_v19 = vld [vmem:[#allocation10_spill] sm:$0xff] }
 0x181   : > { %2874 = vmatmul.msk.f32.gmra.mxu0 %vm434_vm2, %v4859_v16 }
 0x182   : > { %v1023_v56 = vpop.f32.mrf.mxu2 }
 0x183   : > { %v1179_v28 = vpop.f32.mrf.mxu3  ;;  %v1079_v27 = vadd.f32 %v1023_v56, %v761_v24  ;;  %v763_v62 = vpop.f32.mrf.mxu1 }
 0x184   : > { %v764_v35 = vadd.f32 %v763_v62, %v4861_v42  ;;  %v4867_v62 = vld [vmem:[#allocation54_spill] sm:$0xff] }
 0x185   : > { %v1235_v63 = vadd.f32 %v1179_v28, %v1079_v27  ;;  %v2957_v28 = vld [vmem:[%s3153_s25 + $0x80] sm:$0xff]  ;;  %v4866_v27 = vld [vmem:[#allocation18_spill] sm:$0xff] }
 0x186   : > { %2773 = vmatmul.msk.f32.gmra.mxu1 %vm434_vm2, %v3601_v55  ;;  %v1342_v45 = vpop.f32.mrf.mxu0 }
 0x187   : > { %v4099_v47 = vadd.f32 %v1339_v44, %v1235_v63  ;;  %2807 = vmatmul.msk.f32.gmra.mxu2 %vm434_vm2, %v2955_v37 }
 0x188   : > { %2841 = vmatmul.msk.f32.gmra.mxu3 %vm434_vm2, %v4860_v19 }
 0x189   : > { %2875 = vmatmul.msk.f32.gmra.mxu0 %vm434_vm2, %v4862_v59 }
 0x18a   : > { %v1026_v29 = vpop.f32.mrf.mxu2 }
 0x18b   : > { %v1182_v25 = vpop.f32.mrf.mxu3  ;;  %v1080_v43 = vadd.f32 %v1026_v29, %v764_v35  ;;  %v766_v31 = vpop.f32.mrf.mxu1 }
 0x18c   : > { %v767_v40 = vadd.f32 %v766_v31, %v4864_v60  ;;  %v4869_v31 = vld [vmem:[#allocation22_spill] sm:$0xff] }
 0x18d   : > { %v1236_v55 = vadd.f32 %v1182_v25, %v1080_v43  ;;  %v2958_v43 = vld [vmem:[%s3153_s25 + $0x90] sm:$0xff] }
 0x18e   : > { %2774 = vmatmul.msk.f32.gmra.mxu1 %vm434_vm2, %v4859_v16  ;;  %v1345_v1 = vpop.f32.mrf.mxu0 }
 0x18f   : > { %v4110_v3 = vadd.f32 %v1342_v45, %v1236_v55  ;;  %2808 = vmatmul.msk.f32.gmra.mxu2 %vm434_vm2, %v2956_v61  ;;  %v4868_v45 = vld [vmem:[#allocation43_spill] sm:$0xff]  ;;  %v4870_v55 = vld [vmem:[#allocation38_spill] sm:$0xff]  ;;  %v4871_v61 = vld [vmem:[#allocation45_spill] sm:$0xff] }
 0x190   : > { %2842 = vmatmul.msk.f32.gmra.mxu3 %vm434_vm2, %v4863_v12 }
 0x191   : > { %2876 = vmatmul.msk.f32.gmra.mxu0 %vm434_vm2, %v4865_v53 }
 0x192   : > { %v1029_v6 = vpop.f32.mrf.mxu2 }
 0x193   : > { %v1185_v30 = vpop.f32.mrf.mxu3  ;;  %v1081_v44 = vadd.f32 %v1029_v6, %v767_v40  ;;  %v769_v32 = vpop.f32.mrf.mxu1 }
 0x194   : > { %v770_v63 = vadd.f32 %v769_v32, %v4867_v62  ;;  %v2959_v32 = vld [vmem:[%s3153_s25 + $0x98] sm:$0xff] }
 0x195   : > { %v1237_v24 = vadd.f32 %v1185_v30, %v1081_v44 }
 0x196   : > { %2775 = vmatmul.msk.f32.gmra.mxu1 %vm434_vm2, %v4862_v59  ;;  %v1348_v16 = vpop.f32.mrf.mxu0 }
 0x197   : > { %v4121_v56 = vadd.f32 %v1345_v1, %v1237_v24  ;;  %2809 = vmatmul.msk.f32.gmra.mxu2 %vm434_vm2, %v2957_v28  ;;  %v4872_v24 = vld [vmem:[#allocation26_spill] sm:$0xff] }
 0x198   : > { %2843 = vmatmul.msk.f32.gmra.mxu3 %vm434_vm2, %v4866_v27  ;;  %v4874_v27 = vld [vmem:[#allocation47_spill] sm:$0xff] }
 0x199   : > { %2877 = vmatmul.msk.f32.gmra.mxu0 %vm434_vm2, %v4868_v45 }
 0x19a   : > { %v1032_v37 = vpop.f32.mrf.mxu2 }
 0x19b   : > { %v1188_v19 = vpop.f32.mrf.mxu3  ;;  %v1082_v42 = vadd.f32 %v1032_v37, %v770_v63  ;;  %v772_v35 = vpop.f32.mrf.mxu1 }
 0x19c   : > { %v773_v1 = vadd.f32 %v772_v35, %v4870_v55  ;;  %v4877_v55 = vld [vmem:[#allocation50_spill] sm:$0xff] }
 0x19d   : > { %v1238_v59 = vadd.f32 %v1188_v19, %v1082_v42 }
 0x19e   : > { %2776 = vmatmul.msk.f32.gmra.mxu1 %vm434_vm2, %v4865_v53  ;;  %v1351_v29 = vpop.f32.mrf.mxu0 }
 0x19f   : > { %v4132_v25 = vadd.f32 %v1348_v16, %v1238_v59  ;;  %2810 = vmatmul.msk.f32.gmra.mxu2 %vm434_vm2, %v2958_v43  ;;  %v4873_v16 = vld [vmem:[#allocation40_spill] sm:$0xff]  ;;  %v2960_v59 = vld [vmem:[%s3153_s25 + $0xa8] sm:$0xff] }
 0x1a0   : > { %2844 = vmatmul.msk.f32.gmra.mxu3 %vm434_vm2, %v4869_v31  ;;  %v4876_v43 = vld [vmem:[#allocation42_spill] sm:$0xff] }
 0x1a1   : > { %2878 = vmatmul.msk.f32.gmra.mxu0 %vm434_vm2, %v4871_v61 }
 0x1a2   : > { %v1035_v12 = vpop.f32.mrf.mxu2 }
 0x1a3   : > { %v1191_v60 = vpop.f32.mrf.mxu3  ;;  %v1083_v40 = vadd.f32 %v1035_v12, %v773_v1  ;;  %v775_v6 = vpop.f32.mrf.mxu1 }
 0x1a4   : > { %v776_v28 = vadd.f32 %v775_v6, %v4873_v16 }
 0x1a5   : > { %v1239_v53 = vadd.f32 %v1191_v60, %v1083_v40 }
 0x1a6   : > { %2777 = vmatmul.msk.f32.gmra.mxu1 %vm434_vm2, %v4868_v45  ;;  %v1354_v30 = vpop.f32.mrf.mxu0 }
 0x1a7   : > { %v4143_v44 = vadd.f32 %v1351_v29, %v1239_v53  ;;  %2811 = vmatmul.msk.f32.gmra.mxu2 %vm434_vm2, %v2959_v32  ;;  %v4875_v29 = vld [vmem:[#allocation31_spill] sm:$0xff] }
 0x1a8   : > { %2845 = vmatmul.msk.f32.gmra.mxu3 %vm434_vm2, %v4872_v24  ;;  %v4878_v32 = vld [vmem:[#allocation35_spill] sm:$0xff]  ;;  %v4879_v24 = vld [vmem:[#allocation44_spill] sm:$0xff] }
 0x1a9   : > { %2879 = vmatmul.msk.f32.gmra.mxu0 %vm434_vm2, %v4874_v27 }
 0x1aa   : > { %v1038_v62 = vpop.f32.mrf.mxu2 }
 0x1ab   : > { %v1194_v63 = vpop.f32.mrf.mxu3  ;;  %v1084_v37 = vadd.f32 %v1038_v62, %v776_v28  ;;  %v778_v19 = vpop.f32.mrf.mxu1  ;;  %v4880_v28 = vld [vmem:[#allocation53_spill] sm:$0xff] }
 0x1ac   : > { %v779_v31 = vadd.f32 %v778_v19, %v4876_v43  ;;  %v4882_v43 = vld [vmem:[#allocation46_spill] sm:$0xff] }
 0x1ad   : > { %v1240_v45 = vadd.f32 %v1194_v63, %v1084_v37 }
 0x1ae   : > { %2778 = vmatmul.msk.f32.gmra.mxu1 %vm434_vm2, %v4871_v61  ;;  %v1357_v42 = vpop.f32.mrf.mxu0 }
 0x1af   : > { %v4154_v35 = vadd.f32 %v1354_v30, %v1240_v45  ;;  %2812 = vmatmul.msk.f32.gmra.mxu2 %vm434_vm2, %v2960_v59  ;;  %v2961_v30 = vld [vmem:[%s3153_s25 + $0xb0] sm:$0xff]  ;;  %v2962_v59 = vld [vmem:[%s3153_s25 + $0xc0] sm:$0xff] }
 0x1b0   : > { %2846 = vmatmul.msk.f32.gmra.mxu3 %vm434_vm2, %v4875_v29  ;;  %v4881_v29 = vld [vmem:[#allocation7_spill] sm:$0xff] }
 0x1b1   : > { %2880 = vmatmul.msk.f32.gmra.mxu0 %vm434_vm2, %v4877_v55 }
 0x1b2   : > { %v1041_v1 = vpop.f32.mrf.mxu2 }
 0x1b3   : > { %v1197_v12 = vpop.f32.mrf.mxu3  ;;  %v1085_v60 = vadd.f32 %v1041_v1, %v779_v31  ;;  %v781_v40 = vpop.f32.mrf.mxu1  ;;  %v4883_v1 = vld [vmem:[#allocation56_spill] sm:$0xff] }
 0x1b4   : > { %v782_v16 = vadd.f32 %v781_v40, %v4879_v24  ;;  %v4884_v24 = vld [vmem:[#allocation11_spill] sm:$0xff] }
 0x1b5   : > { %v1241_v61 = vadd.f32 %v1197_v12, %v1085_v60 }
 0x1b6   : > { %2779 = vmatmul.msk.f32.gmra.mxu1 %vm434_vm2, %v4874_v27  ;;  %v1360_v6 = vpop.f32.mrf.mxu0 }
 0x1b7   : > { %v4165_v53 = vadd.f32 %v1357_v42, %v1241_v61  ;;  %2813 = vmatmul.msk.f32.gmra.mxu2 %vm434_vm2, %v2961_v30 }
 0x1b8   : > { %2847 = vmatmul.msk.f32.gmra.mxu3 %vm434_vm2, %v4878_v32  ;;  %v2963_v32 = vld [vmem:[%s3153_s25 + $0xc8] sm:$0xff] }
 0x1b9   : > { %2881 = vmatmul.msk.f32.gmra.mxu0 %vm434_vm2, %v4880_v28 }
 0x1ba   : > { %v1044_v62 = vpop.f32.mrf.mxu2 }
 0x1bb   : > { %v1200_v63 = vpop.f32.mrf.mxu3  ;;  %v1086_v37 = vadd.f32 %v1044_v62, %v782_v16  ;;  %v784_v19 = vpop.f32.mrf.mxu1  ;;  %v4885_v16 = vld [vmem:[#allocation49_spill] sm:$0xff] }
 0x1bc   : > { %v785_v31 = vadd.f32 %v784_v19, %v4882_v43  ;;  %v4886_v43 = vld [vmem:[#allocation52_spill] sm:$0xff] }
 0x1bd   : > { %v1242_v27 = vadd.f32 %v1200_v63, %v1086_v37 }
 0x1be   : > { %2780 = vmatmul.msk.f32.gmra.mxu1 %vm434_vm2, %v4877_v55  ;;  %v1363_v45 = vpop.f32.mrf.mxu0 }
 0x1bf   : > { %v4176_v42 = vadd.f32 %v1360_v6, %v1242_v27  ;;  %2814 = vmatmul.msk.f32.gmra.mxu2 %vm434_vm2, %v2962_v59 }
 0x1c0   : > { %2848 = vmatmul.msk.f32.gmra.mxu3 %vm434_vm2, %v4881_v29  ;;  %v2964_v29 = vld [vmem:[%s3153_s25 + $0xd8] sm:$0xff] }
 0x1c1   : > { %2882 = vmatmul.msk.f32.gmra.mxu0 %vm434_vm2, %v4883_v1 }
 0x1c2   : > { %v1047_v12 = vpop.f32.mrf.mxu2 }
 0x1c3   : > { %v1203_v60 = vpop.f32.mrf.mxu3  ;;  %v1087_v40 = vadd.f32 %v1047_v12, %v785_v31  ;;  %v787_v61 = vpop.f32.mrf.mxu1 }
 0x1c4   : > { %v788_v62 = vadd.f32 %v787_v61, %v4885_v16 }
 0x1c5   : > { %v1243_v55 = vadd.f32 %v1203_v60, %v1087_v40 }
 0x1c6   : > { %2781 = vmatmul.msk.f32.gmra.mxu1 %vm434_vm2, %v4880_v28  ;;  %v1366_v6 = vpop.f32.mrf.mxu0 }
 0x1c7   : > { %v4187_v30 = vadd.f32 %v1363_v45, %v1243_v55  ;;  %2815 = vmatmul.msk.f32.gmra.mxu2 %vm434_vm2, %v2963_v32  ;;  %v2965_v32 = vld [vmem:[%s3153_s25 + $0xe0] sm:$0xff] }
 0x1c8   : > { %2849 = vmatmul.msk.f32.gmra.mxu3 %vm434_vm2, %v4884_v24 }
 0x1c9   : > { %2883 = vmatmul.msk.f32.gmra.mxu0 %vm434_vm2, %v3791_v7 }
 0x1ca   : > { %v1050_v63 = vpop.f32.mrf.mxu2 }
 0x1cb   : > { %v1206_v37 = vpop.f32.mrf.mxu3  ;;  %v1088_v19 = vadd.f32 %v1050_v63, %v788_v62  ;;  %v790_v27 = vpop.f32.mrf.mxu1 }
 0x1cc   : > { %v791_v31 = vadd.f32 %v790_v27, %v4886_v43 }
 0x1cd   : > { %v1244_v28 = vadd.f32 %v1206_v37, %v1088_v19 }
 0x1ce   : > { %2782 = vmatmul.msk.f32.gmra.mxu1 %vm434_vm2, %v4883_v1  ;;  %v1369_v45 = vpop.f32.mrf.mxu0 }
 0x1cf   : > { %v4198_v59 = vadd.f32 %v1366_v6, %v1244_v28  ;;  %2816 = vmatmul.msk.f32.gmra.mxu2 %vm434_vm2, %v2964_v29  ;;  %v2966_v28 = vld [vmem:[%s3153_s25 + $0xf0] sm:$0xff] }
 0x1d0   : > { %2850 = vmatmul.msk.f32.gmra.mxu3 %vm434_vm2, %v3273_v54  ;;  %v4887_v54 = vld [vmem:[#allocation55_spill] sm:$0xff] }
 0x1d1   : > { %2884 = vmatmul.msk.f32.gmra.mxu0 %vm434_vm2, %v3807_v0 }
 0x1d2   : > { %v1053_v12 = vpop.f32.mrf.mxu2 }
 0x1d3   : > { %v1209_v60 = vpop.f32.mrf.mxu3  ;;  %v1089_v40 = vadd.f32 %v1053_v12, %v791_v31  ;;  %v793_v61 = vpop.f32.mrf.mxu1 }
 0x1d4   : > { %v794_v24 = vadd.f32 %v793_v61, %v4887_v54 }
 0x1d5   : > { %v1245_v1 = vadd.f32 %v1209_v60, %v1089_v40  ;;  %v2967_v60 = vld [vmem:[%s3153_s25 + $0xf8] sm:$0xff] }
 0x1d6   : > { %2783 = vmatmul.msk.f32.gmra.mxu1 %vm434_vm2, %v3791_v7  ;;  %v1372_v55 = vpop.f32.mrf.mxu0 }
 0x1d7   : > { %v4209_v6 = vadd.f32 %v1369_v45, %v1245_v1  ;;  %2817 = vmatmul.msk.f32.gmra.mxu2 %vm434_vm2, %v2965_v32 }
 0x1d8   : > { %2851 = vmatmul.msk.f32.gmra.mxu3 %vm434_vm2, %v3309_v2 }
 0x1d9   : > { %2885 = vmatmul.msk.f32.gmra.mxu0 %vm434_vm2, %v3822_v23 }
 0x1da   : > { %v1056_v16 = vpop.f32.mrf.mxu2 }
 0x1db   : > { %v1212_v62 = vpop.f32.mrf.mxu3  ;;  %v1090_v63 = vadd.f32 %v1056_v16, %v794_v24  ;;  %v1438_v7 = vpop.f32.mrf.mxu1  ;;  %v2968_v16 = vld [vmem:[%s3153_s25 + $0x108] sm:$0xff] }
 0x1dc   : > { %v1534_v2 = vadd.f32 %v1438_v7, %v3795_v18 }
 0x1dd   : > { %v1246_v37 = vadd.f32 %v1212_v62, %v1090_v63 }
 0x1de   : > { %2784 = vmatmul.msk.f32.gmra.mxu1 %vm434_vm2, %v3807_v0  ;;  %v1913_v19 = vpop.f32.mrf.mxu0 }
 0x1df   : > { %v4220_v27 = vadd.f32 %v1372_v55, %v1246_v37  ;;  %2818 = vmatmul.msk.f32.gmra.mxu2 %vm434_vm2, %v2966_v28 }
 0x1e0   : > { %2852 = vmatmul.msk.f32.gmra.mxu3 %vm434_vm2, %v3364_v49  ;;  %v4239_v49 = vpop.permute.xlu0 %2251 }
 0x1e1   : > { %2886 = vmatmul.msk.f32.gmra.mxu0 %vm434_vm2, %v3838_v26 }
 0x1e2   : > { %v1594_v45 = vpop.f32.mrf.mxu2 }
 0x1e3   : > { %v1754_v29 = vpop.f32.mrf.mxu3  ;;  %v1690_v43 = vadd.f32 %v1594_v45, %v1534_v2  ;;  %v1441_v31 = vpop.f32.mrf.mxu1 }
 0x1e4   : > { %v1535_v40 = vadd.f32 %v1441_v31, %v3811_v22 }
 0x1e5   : > { %v1850_v0 = vadd.f32 %v1754_v29, %v1690_v43 }
 0x1e6   : > { %2785 = vmatmul.msk.f32.gmra.mxu1 %vm434_vm2, %v3822_v23  ;;  %v1916_v18 = vpop.f32.mrf.mxu0 }
 0x1e7   : > { %v2009_v12 = vadd.f32 %v1913_v19, %v1850_v0  ;;  %2819 = vmatmul.msk.f32.gmra.mxu2 %vm434_vm2, %v2967_v60  ;;  %v4888_v60 = vld [vmem:[#allocation57_spill] sm:$0xff] }
 0x1e8   : > { %2853 = vmatmul.msk.f32.gmra.mxu3 %vm434_vm2, %v3409_v58 }
 0x1e9   : > { %2042 = vst.msk [vmem:[%s4235_s26] sm:$0xff] %vm2041_vm4, %v2009_v12  ;;  %v2254_v61 = vadd.f32 %v4239_v49, %v2009_v12  ;;  %2887 = vmatmul.msk.f32.gmra.mxu0 %vm434_vm2, %v3853_v10  ;;  %v2143_v22 = vmul.f32 %v2009_v12, %v2009_v12  ;;  %v2074_v62 = vsel %vm2041_vm4, %v2009_v12, 0.0  ;;  %v2969_v12 = vld [vmem:[%s3153_s25 + $0x110] sm:$0xff] }
 0x1ea   : > { %v1597_v23 = vpop.f32.mrf.mxu2 }
 0x1eb   : > { %v1757_v1 = vpop.f32.mrf.mxu3  ;;  %v1691_v55 = vadd.f32 %v1597_v23, %v1535_v40  ;;  %2318 = vrot.lane.b32.xlu0 %v2254_v61, %s3043_s30  ;;  %v1444_v32 = vpop.f32.mrf.mxu1 }
 0x1ec   : > { %v1536_v63 = vadd.f32 %v1444_v32, %v3826_v48 }
 0x1ed   : > { %v1851_v54 = vadd.f32 %v1757_v1, %v1691_v55 }
 0x1ee   : > { %2786 = vmatmul.msk.f32.gmra.mxu1 %vm434_vm2, %v3838_v26  ;;  %v1919_v58 = vpop.f32.mrf.mxu0 }
 0x1ef   : > { %v2010_v24 = vadd.f32 %v1916_v18, %v1851_v54  ;;  %2820 = vmatmul.msk.f32.gmra.mxu2 %vm434_vm2, %v2968_v16 }
 0x1f0   : > { %2854 = vmatmul.msk.f32.gmra.mxu3 %vm434_vm2, %v4824_v17  ;;  %v2175_v17 = vsel %vm2041_vm4, %v2143_v22, 0.0 }
 0x1f1   : > { %2043 = vst.msk [vmem:[%s4235_s26 + $0x8] sm:$0xff] %vm2041_vm4, %v2010_v24  ;;  %v2075_v7 = vsel %vm2041_vm4, %v2010_v24, 0.0  ;;  %v2144_v37 = vmul.f32 %v2010_v24, %v2010_v24  ;;  %v2255_v26 = vadd.f32 %v4239_v49, %v2010_v24  ;;  %2888 = vmatmul.msk.f32.gmra.mxu0 %vm434_vm2, %v3869_v57 }
 0x1f2   : > { %v2076_v19 = vadd.f32 %v2075_v7, %v2074_v62  ;;  %v1600_v28 = vpop.f32.mrf.mxu2  ;;  %v4889_v7 = vld [vmem:[#allocation24_spill] sm:$0xff] }
 0x1f3   : > { %v1760_v2 = vpop.f32.mrf.mxu3  ;;  %v2176_v45 = vsel %vm2041_vm4, %v2144_v37, 0.0  ;;  %v1692_v48 = vadd.f32 %v1600_v28, %v1536_v63  ;;  %2320 = vrot.lane.b32.xlu1 %v2255_v26, %s3043_s30  ;;  %v1447_v29 = vpop.f32.mrf.mxu1  ;;  %v2970_v63 = vld [vmem:[%s3153_s25 + $0x120] sm:$0xff] }
 0x1f4   : > { %v2177_v43 = vadd.f32 %v2176_v45, %v2175_v17  ;;  %v1537_v40 = vadd.f32 %v1447_v29, %v4888_v60  ;;  %v4891_v60 = vld [vmem:[#allocation12_spill] sm:$0xff] }
 0x1f5   : > { %v1852_v31 = vadd.f32 %v1760_v2, %v1692_v48  ;;  %v4890_v2 = vld [vmem:[#allocation5_spill] sm:$0xff] }
 0x1f6   : > { %2787 = vmatmul.msk.f32.gmra.mxu1 %vm434_vm2, %v3853_v10  ;;  %v1922_v0 = vpop.f32.mrf.mxu0 }
 0x1f7   : > { %v2011_v18 = vadd.f32 %v1919_v58, %v1852_v31  ;;  %2821 = vmatmul.msk.f32.gmra.mxu2 %vm434_vm2, %v2969_v12  ;;  %v2971_v12 = vld [vmem:[%s3153_s25 + $0x128] sm:$0xff] }
 0x1f8   : > { %2855 = vmatmul.msk.f32.gmra.mxu3 %vm434_vm2, %v3501_v13 }
 0x1f9   : > { %2044 = vst.msk [vmem:[%s4235_s26 + $0x10] sm:$0xff] %vm2041_vm4, %v2011_v18  ;;  %v2077_v61 = vsel %vm2041_vm4, %v2011_v18, 0.0  ;;  %v2145_v23 = vmul.f32 %v2011_v18, %v2011_v18  ;;  %v2256_v1 = vadd.f32 %v4239_v49, %v2011_v18  ;;  %2889 = vmatmul.msk.f32.gmra.mxu0 %vm434_vm2, %v3884_v51 }
 0x1fa   : > { %v2078_v10 = vadd.f32 %v2077_v61, %v2076_v19  ;;  %v1603_v55 = vpop.f32.mrf.mxu2 }
 0x1fb   : > { %v1763_v32 = vpop.f32.mrf.mxu3  ;;  %v2178_v54 = vsel %vm2041_vm4, %v2145_v23, 0.0  ;;  %v1693_v13 = vadd.f32 %v1603_v55, %v1537_v40  ;;  %2322 = vrot.lane.b32.xlu1 %v2256_v1, %s3043_s30  ;;  %v1450_v58 = vpop.f32.mrf.mxu1  ;;  %v4892_v40 = vld [vmem:[#allocation32_spill] sm:$0xff] }
 0x1fc   : > { %v2179_v22 = vadd.f32 %v2178_v54, %v2177_v43  ;;  %v1538_v37 = vadd.f32 %v1450_v58, %v4889_v7  ;;  %v4893_v7 = vld [vmem:[#allocation28_spill] sm:$0xff] }
 0x1fd   : > { %v1853_v24 = vadd.f32 %v1763_v32, %v1693_v13 }
 0x1fe   : > { %2788 = vmatmul.msk.f32.gmra.mxu1 %vm434_vm2, %v3869_v57  ;;  %v1925_v16 = vpop.f32.mrf.mxu0 }
 0x1ff   : > { %v2012_v62 = vadd.f32 %v1922_v0, %v1853_v24  ;;  %2822 = vmatmul.msk.f32.gmra.mxu2 %vm434_vm2, %v2970_v63  ;;  %v2972_v63 = vld [vmem:[%s3153_s25 + $0x138] sm:$0xff] }
 0x200   : > { %2856 = vmatmul.msk.f32.gmra.mxu3 %vm434_vm2, %v4830_v34 }
 0x201   : > { %2045 = vst.msk [vmem:[%s4235_s26 + $0x18] sm:$0xff] %vm2041_vm4, %v2012_v62  ;;  %v2079_v26 = vsel %vm2041_vm4, %v2012_v62, 0.0  ;;  %v2146_v19 = vmul.f32 %v2012_v62, %v2012_v62  ;;  %v2257_v28 = vadd.f32 %v4239_v49, %v2012_v62  ;;  %2890 = vmatmul.msk.f32.gmra.mxu0 %vm434_vm2, %v4890_v2 }
 0x202   : > { %v2080_v57 = vadd.f32 %v2079_v26, %v2078_v10  ;;  %v1606_v17 = vpop.f32.mrf.mxu2 }
 0x203   : > { %v1766_v45 = vpop.f32.mrf.mxu3  ;;  %v2180_v48 = vsel %vm2041_vm4, %v2146_v19, 0.0  ;;  %v1694_v34 = vadd.f32 %v1606_v17, %v1538_v37  ;;  %2324 = vrot.lane.b32.xlu2 %v2257_v28, %s3043_s30  ;;  %v1453_v29 = vpop.f32.mrf.mxu1 }
 0x204   : > { %v2181_v43 = vadd.f32 %v2180_v48, %v2179_v22  ;;  %v1539_v61 = vadd.f32 %v1453_v29, %v4892_v40 }
 0x205   : > { %v1854_v31 = vadd.f32 %v1766_v45, %v1694_v34 }
 0x206   : > { %2789 = vmatmul.msk.f32.gmra.mxu1 %vm434_vm2, %v3884_v51  ;;  %v1928_v0 = vpop.f32.mrf.mxu0 }
 0x207   : > { %v2013_v18 = vadd.f32 %v1925_v16, %v1854_v31  ;;  %2823 = vmatmul.msk.f32.gmra.mxu2 %vm434_vm2, %v2971_v12  ;;  %v4895_v12 = vld [vmem:[#allocation19_spill] sm:$0xff] }
 0x208   : > { %2857 = vmatmul.msk.f32.gmra.mxu3 %vm434_vm2, %v4891_v60  ;;  %v4896_v60 = vld [vmem:[#allocation34_spill] sm:$0xff] }
 0x209   : > { %2046 = vst.msk [vmem:[%s4235_s26 + $0x20] sm:$0xff] %vm2041_vm4, %v2013_v18  ;;  %v2081_v23 = vsel %vm2041_vm4, %v2013_v18, 0.0  ;;  %v2147_v1 = vmul.f32 %v2013_v18, %v2013_v18  ;;  %v2258_v10 = vadd.f32 %v4239_v49, %v2013_v18  ;;  %2891 = vmatmul.msk.f32.gmra.mxu0 %vm434_vm2, %v3915_v39  ;;  %v2973_v18 = vld [vmem:[%s3153_s25 + $0x140] sm:$0xff] }
 0x20a   : > { %v2082_v51 = vadd.f32 %v2081_v23, %v2080_v57  ;;  %v1609_v55 = vpop.f32.mrf.mxu2  ;;  %v4894_v57 = vld [vmem:[#allocation6_spill] sm:$0xff] }
 0x20b   : > { %v1769_v32 = vpop.f32.mrf.mxu3  ;;  %v2182_v54 = vsel %vm2041_vm4, %v2147_v1, 0.0  ;;  %v1695_v13 = vadd.f32 %v1609_v55, %v1539_v61  ;;  %2326 = vrot.lane.b32.xlu2 %v2258_v10, %s3043_s30  ;;  %v1456_v58 = vpop.f32.mrf.mxu1 }
 0x20c   : > { %v2183_v22 = vadd.f32 %v2182_v54, %v2181_v43  ;;  %v1540_v37 = vadd.f32 %v1456_v58, %v4893_v7 }
 0x20d   : > { %v1855_v24 = vadd.f32 %v1769_v32, %v1695_v13 }
 0x20e   : > { %2790 = vmatmul.msk.f32.gmra.mxu1 %vm434_vm2, %v4890_v2  ;;  %v1931_v16 = vpop.f32.mrf.mxu0 }
 0x20f   : > { %v2014_v62 = vadd.f32 %v1928_v0, %v1855_v24  ;;  %2824 = vmatmul.msk.f32.gmra.mxu2 %vm434_vm2, %v2972_v63 }
 0x210   : > { %2858 = vmatmul.msk.f32.gmra.mxu3 %vm434_vm2, %v4838_v21 }
 0x211   : > { %2047 = vst.msk [vmem:[%s4235_s26 + $0x28] sm:$0xff] %vm2041_vm4, %v2014_v62  ;;  %v2083_v26 = vsel %vm2041_vm4, %v2014_v62, 0.0  ;;  %v2148_v19 = vmul.f32 %v2014_v62, %v2014_v62  ;;  %v2259_v28 = vadd.f32 %v4239_v49, %v2014_v62  ;;  %2892 = vmatmul.msk.f32.gmra.mxu0 %vm434_vm2, %v4894_v57  ;;  %v4897_v62 = vld [vmem:[#allocation8_spill] sm:$0xff] }
 0x212   : > { %v2084_v2 = vadd.f32 %v2083_v26, %v2082_v51  ;;  %v1612_v17 = vpop.f32.mrf.mxu2 }
 0x213   : > { %v1772_v45 = vpop.f32.mrf.mxu3  ;;  %v2184_v48 = vsel %vm2041_vm4, %v2148_v19, 0.0  ;;  %v1696_v21 = vadd.f32 %v1612_v17, %v1540_v37  ;;  %2328 = vrot.lane.b32.xlu0 %v2259_v28, %s3043_s30  ;;  %v1459_v34 = vpop.f32.mrf.mxu1  ;;  %v4898_v19 = vld [vmem:[#allocation16_spill] sm:$0xff] }
 0x214   : > { %v2185_v29 = vadd.f32 %v2184_v48, %v2183_v22  ;;  %v1541_v40 = vadd.f32 %v1459_v34, %v4896_v60 }
 0x215   : > { %v1856_v43 = vadd.f32 %v1772_v45, %v1696_v21 }
 0x216   : > { %2791 = vmatmul.msk.f32.gmra.mxu1 %vm434_vm2, %v3915_v39  ;;  %v1934_v31 = vpop.f32.mrf.mxu0 }
 0x217   : > { %v2015_v0 = vadd.f32 %v1931_v16, %v1856_v43  ;;  %2825 = vmatmul.msk.f32.gmra.mxu2 %vm434_vm2, %v2973_v18  ;;  %v2974_v16 = vld [vmem:[%s3153_s25 + $0x150] sm:$0xff]  ;;  %v2975_v43 = vld [vmem:[%s3153_s25 + $0x158] sm:$0xff] }
 0x218   : > { %2859 = vmatmul.msk.f32.gmra.mxu3 %vm434_vm2, %v4895_v12 }
 0x219   : > { %2048 = vst.msk [vmem:[%s4235_s26 + $0x30] sm:$0xff] %vm2041_vm4, %v2015_v0  ;;  %v2085_v61 = vsel %vm2041_vm4, %v2015_v0, 0.0  ;;  %v2149_v23 = vmul.f32 %v2015_v0, %v2015_v0  ;;  %v2260_v1 = vadd.f32 %v4239_v49, %v2015_v0  ;;  %2893 = vmatmul.msk.f32.gmra.mxu0 %vm434_vm2, %v3946_v20  ;;  %v4900_v0 = vld [vmem:[#allocation13_spill] sm:$0xff] }
 0x21a   : > { %v2086_v39 = vadd.f32 %v2085_v61, %v2084_v2  ;;  %v1615_v10 = vpop.f32.mrf.mxu2 }
 0x21b   : > { %v1775_v51 = vpop.f32.mrf.mxu3  ;;  %v2186_v55 = vsel %vm2041_vm4, %v2149_v23, 0.0  ;;  %v1697_v32 = vadd.f32 %v1615_v10, %v1541_v40  ;;  %2330 = vrot.lane.b32.xlu1 %v2260_v1, %s3043_s30  ;;  %v1462_v54 = vpop.f32.mrf.mxu1 }
 0x21c   : > { %v2187_v13 = vadd.f32 %v2186_v55, %v2185_v29  ;;  %v1542_v63 = vadd.f32 %v1462_v54, %v4897_v62 }
 0x21d   : > { %v1857_v58 = vadd.f32 %v1775_v51, %v1697_v32 }
 0x21e   : > { %2792 = vmatmul.msk.f32.gmra.mxu1 %vm434_vm2, %v4894_v57  ;;  %v1937_v22 = vpop.f32.mrf.mxu0 }
 0x21f   : > { %v2016_v24 = vadd.f32 %v1934_v31, %v1857_v58  ;;  %2826 = vmatmul.msk.f32.gmra.mxu2 %vm434_vm2, %v2974_v16  ;;  %v4899_v31 = vld [vmem:[#allocation27_spill] sm:$0xff]  ;;  %v4901_v58 = vld [vmem:[#allocation33_spill] sm:$0xff] }
 0x220   : > { %2860 = vmatmul.msk.f32.gmra.mxu3 %vm434_vm2, %v4846_v50 }
 0x221   : > { %2049 = vst.msk [vmem:[%s4235_s26 + $0x38] sm:$0xff] %vm2041_vm4, %v2016_v24  ;;  %v2087_v7 = vsel %vm2041_vm4, %v2016_v24, 0.0  ;;  %v2150_v37 = vmul.f32 %v2016_v24, %v2016_v24  ;;  %v2261_v26 = vadd.f32 %v4239_v49, %v2016_v24  ;;  %2894 = vmatmul.msk.f32.gmra.mxu0 %vm434_vm2, %v4898_v19 }
 0x222   : > { %v2088_v28 = vadd.f32 %v2087_v7, %v2086_v39  ;;  %v1618_v57 = vpop.f32.mrf.mxu2 }
 0x223   : > { %v1778_v2 = vpop.f32.mrf.mxu3  ;;  %v2188_v17 = vsel %vm2041_vm4, %v2150_v37, 0.0  ;;  %v1698_v50 = vadd.f32 %v1618_v57, %v1542_v63  ;;  %2332 = vrot.lane.b32.xlu2 %v2261_v26, %s3043_s30  ;;  %v1465_v45 = vpop.f32.mrf.mxu1 }
 0x224   : > { %v2189_v48 = vadd.f32 %v2188_v17, %v2187_v13  ;;  %v1543_v18 = vadd.f32 %v1465_v45, %v4900_v0  ;;  %v2976_v13 = vld [vmem:[%s3153_s25 + $0x168] sm:$0xff] }
 0x225   : > { %v1858_v21 = vadd.f32 %v1778_v2, %v1698_v50 }
 0x226   : > { %2793 = vmatmul.msk.f32.gmra.mxu1 %vm434_vm2, %v3946_v20  ;;  %v1940_v34 = vpop.f32.mrf.mxu0 }
 0x227   : > { %v2017_v29 = vadd.f32 %v1937_v22, %v1858_v21  ;;  %2827 = vmatmul.msk.f32.gmra.mxu2 %vm434_vm2, %v2975_v43  ;;  %v4902_v22 = vld [vmem:[#allocation9_spill] sm:$0xff]  ;;  %v4903_v21 = vld [vmem:[#allocation36_spill] sm:$0xff] }
 0x228   : > { %2861 = vmatmul.msk.f32.gmra.mxu3 %vm434_vm2, %v4899_v31 }
 0x229   : > { %2050 = vst.msk [vmem:[%s4235_s26 + $0x40] sm:$0xff] %vm2041_vm4, %v2017_v29  ;;  %v2089_v12 = vsel %vm2041_vm4, %v2017_v29, 0.0  ;;  %v2151_v60 = vmul.f32 %v2017_v29, %v2017_v29  ;;  %v2262_v40 = vadd.f32 %v4239_v49, %v2017_v29  ;;  %2895 = vmatmul.msk.f32.gmra.mxu0 %vm434_vm2, %v3977_v41 }
 0x22a   : > { %v2090_v20 = vadd.f32 %v2089_v12, %v2088_v28  ;;  %v1621_v61 = vpop.f32.mrf.mxu2  ;;  %v1408_v12 = vrot.slane %v3988_v38, 2 }
 0x22b   : > { %v1781_v23 = vpop.f32.mrf.mxu3  ;;  %v2190_v1 = vsel %vm2041_vm4, %v2151_v60, 0.0  ;;  %v1699_v39 = vadd.f32 %v1621_v61, %v1543_v18  ;;  %2334 = vrot.lane.b32.xlu0 %v2262_v40, %s3043_s30  ;;  %v1468_v10 = vpop.f32.mrf.mxu1 }
 0x22c   : > { %v2191_v51 = vadd.f32 %v2190_v1, %v2189_v48  ;;  %v1544_v24 = vadd.f32 %v1468_v10, %v4902_v22  ;;  %v2977_v48 = vld [vmem:[%s3153_s25 + $0x170] sm:$0xff] }
 0x22d   : > { %v1859_v55 = vadd.f32 %v1781_v23, %v1699_v39 }
 0x22e   : > { %2794 = vmatmul.msk.f32.gmra.mxu1 %vm434_vm2, %v4898_v19  ;;  %v1943_v32 = vpop.f32.mrf.mxu0 }
 0x22f   : > { %v2018_v54 = vadd.f32 %v1940_v34, %v1859_v55  ;;  %2828 = vmatmul.msk.f32.gmra.mxu2 %vm434_vm2, %v2976_v13  ;;  %v4904_v34 = vld [vmem:[#allocation14_spill] sm:$0xff] }
 0x230   : > { %2862 = vmatmul.msk.f32.gmra.mxu3 %vm434_vm2, %v4901_v58 }
 0x231   : > { %2051 = vst.msk [vmem:[%s4235_s26 + $0x48] sm:$0xff] %vm2041_vm4, %v2018_v54  ;;  %v2091_v16 = vsel %vm2041_vm4, %v2018_v54, 0.0  ;;  %v2152_v62 = vmul.f32 %v2018_v54, %v2018_v54  ;;  %v2263_v63 = vadd.f32 %v4239_v49, %v2018_v54  ;;  %2896 = vmatmul.msk.f32.gmra.mxu0 %vm434_vm2, %v4001_v4  ;;  %v4906_v54 = vld [vmem:[#allocation20_spill] sm:$0xff] }
 0x232   : > { %v2092_v7 = vadd.f32 %v2091_v16, %v2090_v20  ;;  %v1624_v37 = vpop.f32.mrf.mxu2 }
 0x233   : > { %v1784_v26 = vpop.f32.mrf.mxu3  ;;  %v2192_v19 = vsel %vm2041_vm4, %v2152_v62, 0.0  ;;  %v1700_v28 = vadd.f32 %v1624_v37, %v1544_v24  ;;  %2336 = vrot.lane.b32.xlu1 %v2263_v63, %s3043_s30  ;;  %v1471_v57 = vpop.f32.mrf.mxu1  ;;  %v1410_v63 = vrot.slane %v4015_v14, 2 }
 0x234   : > { %v2193_v2 = vadd.f32 %v2192_v19, %v2191_v51  ;;  %v1545_v29 = vadd.f32 %v1471_v57, %v4904_v34  ;;  %v300_v57 = vld [vmem:[%s3153_s25 + $0x1a0] sm:$0xff] }
 0x235   : > { %v1860_v17 = vadd.f32 %v1784_v26, %v1700_v28  ;;  %v299_v28 = vld [vmem:[%s3153_s25 + $0x198] sm:$0xff] }
 0x236   : > { %2795 = vmatmul.msk.f32.gmra.mxu1 %vm434_vm2, %v3977_v41  ;;  %v1946_v50 = vpop.f32.mrf.mxu0  ;;  %v4905_v41 = vld [vmem:[#allocation17_spill] sm:$0xff]  ;;  %v1723_v14 = vrot.slane %v299_v28, 1 }
 0x237   : > { %v2019_v45 = vadd.f32 %v1943_v32, %v1860_v17  ;;  %2829 = vmatmul.msk.f32.gmra.mxu2 %vm434_vm2, %v2977_v48  ;;  %v1407_v18 = vrot.slane %v4905_v41, 2  ;;  %v1411_v17 = vsel %vm796_vm3, %v1408_v12, %v1410_v63  ;;  %v4907_v48 = vld [vmem:[#allocation23_spill] sm:$0xff] }
 0x238   : > { %2863 = vmatmul.msk.f32.gmra.mxu3 %vm434_vm2, %v4903_v21 }
 0x239   : > { %2052 = vst.msk [vmem:[%s4235_s26 + $0x50] sm:$0xff] %vm2041_vm4, %v2019_v45  ;;  %v2093_v43 = vsel %vm2041_vm4, %v2019_v45, 0.0  ;;  %v2153_v31 = vmul.f32 %v2019_v45, %v2019_v45  ;;  %v2264_v0 = vadd.f32 %v4239_v49, %v2019_v45  ;;  %2897 = vmatmul.msk.f32.gmra.mxu0 %vm434_vm2, %v4023_v46  ;;  %v1409_v55 = vsel %vm796_vm3, %v1407_v18, %v1408_v12 }
 0x23a   : > { %v2094_v60 = vadd.f32 %v2093_v43, %v2092_v7  ;;  %v1627_v40 = vpop.f32.mrf.mxu2  ;;  %v1724_v45 = vrot.slane %v300_v57, 1 }
 0x23b   : > { %v1787_v20 = vpop.f32.mrf.mxu3  ;;  %v2194_v61 = vsel %vm2041_vm4, %v2153_v31, 0.0  ;;  %v1701_v23 = vadd.f32 %v1627_v40, %v1545_v29  ;;  %2338 = vrot.lane.b32.xlu2 %v2264_v0, %s3043_s30  ;;  %v1474_v1 = vpop.f32.mrf.mxu1  ;;  %v1882_v0 = vrot.slane %v299_v28, 2 }
 0x23c   : > { %v2195_v39 = vadd.f32 %v2194_v61, %v2193_v2  ;;  %v1546_v13 = vadd.f32 %v1474_v1, %v4906_v54  ;;  %v1725_v40 = vsel %vm351_vm1, %v1723_v14, %v1724_v45  ;;  %v301_v61 = vld [vmem:[%s3153_s25 + $0x1a8] sm:$0x3]  ;;  %s2998_s25 = scalar_lea.hbm %s4691_s4, 4 }
 0x23d   : > { %v1861_v10 = vadd.f32 %v1787_v20, %v1701_v23  ;;  %p3000_p1 = scmp.lt.s32.totalorder %s2998_s25, %s2994_s23 }
 0x23e   : > { %2796 = vmatmul.msk.f32.gmra.mxu1 %vm434_vm2, %v4001_v4  ;;  %v1949_v51 = vpop.f32.mrf.mxu0 }
 0x23f   : > { %v2020_v32 = vadd.f32 %v1946_v50, %v1861_v10  ;;  %2830 = vmatmul.msk.f32.gmra.mxu2 %vm434_vm2, %v4905_v41  ;;  %v1883_v41 = vrot.slane %v300_v57, 2  ;;  %v1726_v10 = vrot.slane %v301_v61, 1  ;;  %p3001_p2 = por %p3000_p1, %p2999_p0 }
 0x240   : > { %2864 = vmatmul.msk.f32.gmra.mxu3 %vm434_vm2, %v4006_v11 }
 0x241   : > { %2053 = vst.msk [vmem:[%s4235_s26 + $0x58] sm:$0xff] %vm2041_vm4, %v2020_v32  ;;  %v2095_v58 = vsel %vm2041_vm4, %v2020_v32, 0.0  ;;  %v2154_v22 = vmul.f32 %v2020_v32, %v2020_v32  ;;  %v2265_v4 = vadd.f32 %v4239_v49, %v2020_v32  ;;  %2898 = vmatmul.msk.f32.gmra.mxu0 %vm434_vm2, %v1409_v55  ;;  %v1884_v1 = vsel %vm796_vm3, %v1882_v0, %v1883_v41  ;;  %p3002_p3 = pnand %p3001_p2, %p2997_p13 }
 0x242   : > { %v2096_v24 = vadd.f32 %v2095_v58, %v2094_v60  ;;  %v1630_v16 = vpop.f32.mrf.mxu2  ;;  %v1727_v63 = vsel %vm351_vm1, %v1724_v45, %v1726_v10 }
 0x243   : > { %v1790_v62 = vpop.f32.mrf.mxu3  ;;  %v2196_v11 = vsel %vm2041_vm4, %v2154_v22, 0.0  ;;  %v1702_v7 = vadd.f32 %v1630_v16, %v1546_v13  ;;  %2340 = vrot.lane.b32.xlu0 %v2265_v4, %s3043_s30  ;;  %v1477_v37 = vpop.f32.mrf.mxu1  ;;  %v1885_v4 = vrot.slane %v301_v61, 2 }
 0x244   : > { %v2197_v26 = vadd.f32 %v2196_v11, %v2195_v39  ;;  %v1547_v21 = vadd.f32 %v1477_v37, %v4907_v48 }
 0x245   : > { %v1862_v19 = vadd.f32 %v1790_v62, %v1702_v7  ;;  %v1886_v37 = vsel %vm796_vm3, %v1883_v41, %v1885_v4 }
 0x246   : > { %2797 = vmatmul.msk.f32.gmra.mxu1 %vm434_vm2, %v4023_v46  ;;  %v1952_v2 = vpop.f32.mrf.mxu0 }
 0x247   : > { %v2021_v50 = vadd.f32 %v1949_v51, %v1862_v19  ;;  %2831 = vmatmul.msk.f32.gmra.mxu2 %vm434_vm2, %v3988_v38 }
 0x248   : > { %2865 = vmatmul.msk.f32.gmra.mxu3 %vm434_vm2, %v4031_v8 }
 0x249   : > { %2054 = vst.msk [vmem:[%s4235_s26 + $0x60] sm:$0xff] %vm2041_vm4, %v2021_v50  ;;  %v2097_v34 = vsel %vm2041_vm4, %v2021_v50, 0.0  ;;  %v2155_v46 = vmul.f32 %v2021_v50, %v2021_v50  ;;  %v2266_v29 = vadd.f32 %v4239_v49, %v2021_v50  ;;  %2899 = vmatmul.msk.f32.gmra.mxu0 %vm434_vm2, %v1411_v17 }
 0x24a   : > { %v2098_v43 = vadd.f32 %v2097_v34, %v2096_v24  ;;  %v1633_v31 = vpop.f32.mrf.mxu2 }
 0x24b   : > { %v1793_v38 = vpop.f32.mrf.mxu3  ;;  %v2198_v8 = vsel %vm2041_vm4, %v2155_v46, 0.0  ;;  %v1703_v18 = vadd.f32 %v1633_v31, %v1547_v21  ;;  %2342 = vrot.lane.b32.xlu1 %v2266_v29, %s3043_s30  ;;  %v1480_v12 = vpop.f32.mrf.mxu1 }
 0x24c   : > { %v2199_v60 = vadd.f32 %v2198_v8, %v2197_v26  ;;  %v1548_v51 = vadd.f32 %v1480_v12, %v4033_v33 }
 0x24d   : > { %v1863_v20 = vadd.f32 %v1793_v38, %v1703_v18 }
 0x24e   : > { %2798 = vmatmul.msk.f32.gmra.mxu1 %vm434_vm2, %v1409_v55  ;;  %v1955_v23 = vpop.f32.mrf.mxu0 }
 0x24f   : > { %v2022_v39 = vadd.f32 %v1952_v2, %v1863_v20  ;;  %2832 = vmatmul.msk.f32.gmra.mxu2 %vm434_vm2, %v299_v28 }
 0x250   : > { %2866 = vmatmul.msk.f32.gmra.mxu3 %vm434_vm2, %v1725_v40 }
 0x251   : > { %2055 = vst.msk [vmem:[%s4235_s26 + $0x68] sm:$0xff] %vm2041_vm4, %v2022_v39  ;;  %v2099_v32 = vsel %vm2041_vm4, %v2022_v39, 0.0  ;;  %v2156_v54 = vmul.f32 %v2022_v39, %v2022_v39  ;;  %v2267_v13 = vadd.f32 %v4239_v49, %v2022_v39  ;;  %2900 = vmatmul.msk.f32.gmra.mxu0 %vm434_vm2, %v1884_v1 }
 0x252   : > { %v2100_v55 = vadd.f32 %v2099_v32, %v2098_v43  ;;  %v1636_v58 = vpop.f32.mrf.mxu2 }
 0x253   : > { %v1796_v22 = vpop.f32.mrf.mxu3  ;;  %v2200_v24 = vsel %vm2041_vm4, %v2156_v54, 0.0  ;;  %v1704_v16 = vadd.f32 %v1636_v58, %v1548_v51  ;;  %2344 = vrot.lane.b32.xlu2 %v2267_v13, %s3043_s30  ;;  %v1483_v33 = vpop.f32.mrf.mxu1 }
 0x254   : > { %v2201_v62 = vadd.f32 %v2200_v24, %v2199_v60  ;;  %v1549_v19 = vadd.f32 %v1483_v33, %v4044_v9 }
 0x255   : > { %v1864_v11 = vadd.f32 %v1796_v22, %v1704_v16 }
 0x256   : > { %2799 = vmatmul.msk.f32.gmra.mxu1 %vm434_vm2, %v1411_v17  ;;  %v1958_v7 = vpop.f32.mrf.mxu0 }
 0x257   : > { %v2023_v26 = vadd.f32 %v1955_v23, %v1864_v11  ;;  %2833 = vmatmul.msk.f32.gmra.mxu2 %vm434_vm2, %v300_v57 }
 0x258   : > { %2867 = vmatmul.msk.f32.gmra.mxu3 %vm434_vm2, %v1727_v63 }
 0x259   : > { %2056 = vst.msk [vmem:[%s4235_s26 + $0x70] sm:$0xff] %vm2041_vm4, %v2023_v26  ;;  %v2101_v28 = vsel %vm2041_vm4, %v2023_v26, 0.0  ;;  %v2157_v2 = vmul.f32 %v2023_v26, %v2023_v26  ;;  %v2268_v50 = vadd.f32 %v4239_v49, %v2023_v26  ;;  %2901 = vmatmul.msk.f32.gmra.mxu0 %vm434_vm2, %v1886_v37 }
 0x25a   : > { %v2102_v17 = vadd.f32 %v2101_v28, %v2100_v55  ;;  %v1639_v14 = vpop.f32.mrf.mxu2 }
 0x25b   : > { %v1799_v45 = vpop.f32.mrf.mxu3  ;;  %v2202_v48 = vsel %vm2041_vm4, %v2157_v2, 0.0  ;;  %v1705_v57 = vadd.f32 %v1639_v14, %v1549_v19  ;;  %2346 = vrot.lane.b32.xlu0 %v2268_v50, %s3043_s30  ;;  %v1486_v21 = vpop.f32.mrf.mxu1 }
 0x25c   : > { %v2203_v9 = vadd.f32 %v2202_v48, %v2201_v62  ;;  %v1550_v38 = vadd.f32 %v1486_v21, %v4055_v15 }
 0x25d   : > { %v1865_v34 = vadd.f32 %v1799_v45, %v1705_v57  ;;  %v2319_v46 = vpop.permute.xlu0 %2318  ;;  %v2325_v29 = vpop.permute.xlu2 %2324 }
 0x25e   : > { %2414 = vst.msk [vmem:[%s4471_s7] sm:$0xff] %vm2041_vm4, %v2319_v46  ;;  %v1961_v43 = vpop.f32.mrf.mxu0 }
 0x25f   : > { %2417 = vst.msk [vmem:[%s4471_s7 + $0x18] sm:$0xff] %vm2041_vm4, %v2325_v29  ;;  %v2024_v31 = vadd.f32 %v1958_v7, %v1865_v34 }
 0x261   : > { %2057 = vst.msk [vmem:[%s4235_s26 + $0x78] sm:$0xff] %vm2041_vm4, %v2024_v31  ;;  %v2103_v0 = vsel %vm2041_vm4, %v2024_v31, 0.0  ;;  %v2158_v41 = vmul.f32 %v2024_v31, %v2024_v31  ;;  %v2269_v8 = vadd.f32 %v4239_v49, %v2024_v31 }
 0x262   : > { %v2104_v18 = vadd.f32 %v2103_v0, %v2102_v17  ;;  %v1642_v12 = vpop.f32.mrf.mxu2 }
 0x263   : > { %v1802_v60 = vpop.f32.mrf.mxu3  ;;  %v2204_v40 = vsel %vm2041_vm4, %v2158_v41, 0.0  ;;  %v1706_v20 = vadd.f32 %v1642_v12, %v1550_v38  ;;  %2348 = vrot.lane.b32.xlu1 %v2269_v8, %s3043_s30  ;;  %v1489_v61 = vpop.f32.mrf.mxu1 }
 0x264   : > { %v2205_v15 = vadd.f32 %v2204_v40, %v2203_v9  ;;  %v1551_v32 = vadd.f32 %v1489_v61, %v4066_v36 }
 0x265   : > { %v1866_v23 = vadd.f32 %v1802_v60, %v1706_v20  ;;  %v2321_v1 = vpop.permute.xlu1 %2320  ;;  %v2327_v39 = vpop.permute.xlu2 %2326 }
 0x266   : > { %2415 = vst.msk [vmem:[%s4471_s7 + $0x8] sm:$0xff] %vm2041_vm4, %v2321_v1  ;;  %v1964_v10 = vpop.f32.mrf.mxu0 }
 0x267   : > { %2418 = vst.msk [vmem:[%s4471_s7 + $0x20] sm:$0xff] %vm2041_vm4, %v2327_v39  ;;  %v2025_v51 = vadd.f32 %v1961_v43, %v1866_v23 }
 0x269   : > { %2058 = vst.msk [vmem:[%s4235_s26 + $0x80] sm:$0xff] %vm2041_vm4, %v2025_v51  ;;  %v2105_v54 = vsel %vm2041_vm4, %v2025_v51, 0.0  ;;  %v2159_v13 = vmul.f32 %v2025_v51, %v2025_v51  ;;  %v2270_v55 = vadd.f32 %v4239_v49, %v2025_v51 }
 0x26a   : > { %v2106_v58 = vadd.f32 %v2105_v54, %v2104_v18  ;;  %v1645_v22 = vpop.f32.mrf.mxu2 }
 0x26b   : > { %v1805_v4 = vpop.f32.mrf.mxu3  ;;  %v2206_v24 = vsel %vm2041_vm4, %v2159_v13, 0.0  ;;  %v1707_v16 = vadd.f32 %v1645_v22, %v1551_v32  ;;  %2350 = vrot.lane.b32.xlu2 %v2270_v55, %s3043_s30  ;;  %v1492_v33 = vpop.f32.mrf.mxu1 }
 0x26c   : > { %v2207_v62 = vadd.f32 %v2206_v24, %v2205_v15  ;;  %v1552_v37 = vadd.f32 %v1492_v33, %v4077_v5 }
 0x26d   : > { %v1867_v63 = vadd.f32 %v1805_v4, %v1707_v16  ;;  %v2323_v36 = vpop.permute.xlu1 %2322 }
 0x26e   : > { %2416 = vst.msk [vmem:[%s4471_s7 + $0x10] sm:$0xff] %vm2041_vm4, %v2323_v36  ;;  %v1967_v11 = vpop.f32.mrf.mxu0 }
 0x26f   : > { %v2026_v7 = vadd.f32 %v1964_v10, %v1867_v63 }
 0x271   : > { %2059 = vst.msk [vmem:[%s4235_s26 + $0x88] sm:$0xff] %vm2041_vm4, %v2026_v7  ;;  %v2107_v26 = vsel %vm2041_vm4, %v2026_v7, 0.0  ;;  %v2160_v19 = vmul.f32 %v2026_v7, %v2026_v7  ;;  %v2271_v28 = vadd.f32 %v4239_v49, %v2026_v7 }
 0x272   : > { %v2108_v2 = vadd.f32 %v2107_v26, %v2106_v58  ;;  %v1648_v50 = vpop.f32.mrf.mxu2 }
 0x273   : > { %v1808_v17 = vpop.f32.mrf.mxu3  ;;  %v2208_v14 = vsel %vm2041_vm4, %v2160_v19, 0.0  ;;  %v1708_v45 = vadd.f32 %v1648_v50, %v1552_v37  ;;  %2352 = vrot.lane.b32.xlu0 %v2271_v28, %s3043_s30  ;;  %v1495_v48 = vpop.f32.mrf.mxu1 }
 0x274   : > { %v2209_v57 = vadd.f32 %v2208_v14, %v2207_v62  ;;  %v1553_v34 = vadd.f32 %v1495_v48, %v4088_v52 }
 0x275   : > { %v1868_v21 = vadd.f32 %v1808_v17, %v1708_v45 }
 0x276   : > { %v1970_v5 = vpop.f32.mrf.mxu0 }
 0x277   : > { %v2027_v9 = vadd.f32 %v1967_v11, %v1868_v21 }
 0x279   : > { %2060 = vst.msk [vmem:[%s4235_s26 + $0x90] sm:$0xff] %vm2041_vm4, %v2027_v9  ;;  %v2109_v46 = vsel %vm2041_vm4, %v2027_v9, 0.0  ;;  %v2161_v29 = vmul.f32 %v2027_v9, %v2027_v9  ;;  %v2272_v43 = vadd.f32 %v4239_v49, %v2027_v9 }
 0x27a   : > { %v2110_v31 = vadd.f32 %v2109_v46, %v2108_v2  ;;  %v1651_v38 = vpop.f32.mrf.mxu2 }
 0x27b   : > { %v1811_v0 = vpop.f32.mrf.mxu3  ;;  %v2210_v41 = vsel %vm2041_vm4, %v2161_v29, 0.0  ;;  %v1709_v8 = vadd.f32 %v1651_v38, %v1553_v34  ;;  %2354 = vrot.lane.b32.xlu1 %v2272_v43, %s3043_s30  ;;  %v1498_v18 = vpop.f32.mrf.mxu1 }
 0x27c   : > { %v2211_v12 = vadd.f32 %v2210_v41, %v2209_v57  ;;  %v1554_v61 = vadd.f32 %v1498_v18, %v4099_v47 }
 0x27d   : > { %v1869_v60 = vadd.f32 %v1811_v0, %v1709_v8  ;;  %v2333_v52 = vpop.permute.xlu2 %2332 }
 0x27e   : > { %2421 = vst.msk [vmem:[%s4471_s7 + $0x38] sm:$0xff] %vm2041_vm4, %v2333_v52  ;;  %v1973_v40 = vpop.f32.mrf.mxu0 }
 0x27f   : > { %v2028_v20 = vadd.f32 %v1970_v5, %v1869_v60 }
 0x281   : > { %2061 = vst.msk [vmem:[%s4235_s26 + $0x98] sm:$0xff] %vm2041_vm4, %v2028_v20  ;;  %v2111_v15 = vsel %vm2041_vm4, %v2028_v20, 0.0  ;;  %v2162_v23 = vmul.f32 %v2028_v20, %v2028_v20  ;;  %v2273_v1 = vadd.f32 %v4239_v49, %v2028_v20 }
 0x282   : > { %v2112_v39 = vadd.f32 %v2111_v15, %v2110_v31  ;;  %v1654_v10 = vpop.f32.mrf.mxu2 }
 0x283   : > { %v1814_v51 = vpop.f32.mrf.mxu3  ;;  %v2212_v32 = vsel %vm2041_vm4, %v2162_v23, 0.0  ;;  %v1710_v54 = vadd.f32 %v1654_v10, %v1554_v61  ;;  %2356 = vrot.lane.b32.xlu2 %v2273_v1, %s3043_s30  ;;  %v1501_v13 = vpop.f32.mrf.mxu1 }
 0x284   : > { %v2213_v55 = vadd.f32 %v2212_v32, %v2211_v12  ;;  %v1555_v24 = vadd.f32 %v1501_v13, %v4110_v3 }
 0x285   : > { %v1870_v58 = vadd.f32 %v1814_v51, %v1710_v54  ;;  %v2329_v47 = vpop.permute.xlu0 %2328 }
 0x286   : > { %2419 = vst.msk [vmem:[%s4471_s7 + $0x28] sm:$0xff] %vm2041_vm4, %v2329_v47  ;;  %v1976_v22 = vpop.f32.mrf.mxu0 }
 0x287   : > { %v2029_v4 = vadd.f32 %v1973_v40, %v1870_v58 }
 0x289   : > { %2062 = vst.msk [vmem:[%s4235_s26 + $0xa0] sm:$0xff] %vm2041_vm4, %v2029_v4  ;;  %v2113_v16 = vsel %vm2041_vm4, %v2029_v4, 0.0  ;;  %v2163_v33 = vmul.f32 %v2029_v4, %v2029_v4  ;;  %v2274_v62 = vadd.f32 %v4239_v49, %v2029_v4 }
 0x28a   : > { %v2114_v63 = vadd.f32 %v2113_v16, %v2112_v39  ;;  %v1657_v36 = vpop.f32.mrf.mxu2 }
 0x28b   : > { %v1817_v11 = vpop.f32.mrf.mxu3  ;;  %v2214_v7 = vsel %vm2041_vm4, %v2163_v33, 0.0  ;;  %v1711_v37 = vadd.f32 %v1657_v36, %v1555_v24  ;;  %2358 = vrot.lane.b32.xlu0 %v2274_v62, %s3043_s30  ;;  %v1504_v26 = vpop.f32.mrf.mxu1 }
 0x28c   : > { %v2215_v19 = vadd.f32 %v2214_v7, %v2213_v55  ;;  %v1556_v17 = vadd.f32 %v1504_v26, %v4121_v56 }
 0x28d   : > { %v1871_v28 = vadd.f32 %v1817_v11, %v1711_v37  ;;  %v2331_v3 = vpop.permute.xlu1 %2330 }
 0x28e   : > { %2420 = vst.msk [vmem:[%s4471_s7 + $0x30] sm:$0xff] %vm2041_vm4, %v2331_v3  ;;  %v1979_v2 = vpop.f32.mrf.mxu0 }
 0x28f   : > { %v2030_v50 = vadd.f32 %v1976_v22, %v1871_v28 }
 0x291   : > { %2063 = vst.msk [vmem:[%s4235_s26 + $0xa8] sm:$0xff] %vm2041_vm4, %v2030_v50  ;;  %v2115_v14 = vsel %vm2041_vm4, %v2030_v50, 0.0  ;;  %v2164_v45 = vmul.f32 %v2030_v50, %v2030_v50  ;;  %v2275_v48 = vadd.f32 %v4239_v49, %v2030_v50 }
 0x292   : > { %v2116_v57 = vadd.f32 %v2115_v14, %v2114_v63  ;;  %v1660_v21 = vpop.f32.mrf.mxu2 }
 0x293   : > { %v1820_v5 = vpop.f32.mrf.mxu3  ;;  %v2216_v9 = vsel %vm2041_vm4, %v2164_v45, 0.0  ;;  %v1712_v34 = vadd.f32 %v1660_v21, %v1556_v17  ;;  %2360 = vrot.lane.b32.xlu1 %v2275_v48, %s3043_s30  ;;  %v1507_v46 = vpop.f32.mrf.mxu1 }
 0x294   : > { %v2217_v29 = vadd.f32 %v2216_v9, %v2215_v19  ;;  %v1557_v0 = vadd.f32 %v1507_v46, %v4132_v25 }
 0x295   : > { %v1872_v43 = vadd.f32 %v1820_v5, %v1712_v34  ;;  %v2339_v56 = vpop.permute.xlu2 %2338 }
 0x296   : > { %2424 = vst.msk [vmem:[%s4471_s7 + $0x50] sm:$0xff] %vm2041_vm4, %v2339_v56  ;;  %v1982_v31 = vpop.f32.mrf.mxu0 }
 0x297   : > { %v2031_v38 = vadd.f32 %v1979_v2, %v1872_v43 }
 0x299   : > { %2064 = vst.msk [vmem:[%s4235_s26 + $0xb0] sm:$0xff] %vm2041_vm4, %v2031_v38  ;;  %v2117_v41 = vsel %vm2041_vm4, %v2031_v38, 0.0  ;;  %v2165_v8 = vmul.f32 %v2031_v38, %v2031_v38  ;;  %v2276_v18 = vadd.f32 %v4239_v49, %v2031_v38 }
 0x29a   : > { %v2118_v12 = vadd.f32 %v2117_v41, %v2116_v57  ;;  %v1663_v60 = vpop.f32.mrf.mxu2 }
 0x29b   : > { %v1823_v52 = vpop.f32.mrf.mxu3  ;;  %v2218_v40 = vsel %vm2041_vm4, %v2165_v8, 0.0  ;;  %v1713_v20 = vadd.f32 %v1663_v60, %v1557_v0  ;;  %2362 = vrot.lane.b32.xlu2 %v2276_v18, %s3043_s30  ;;  %v1510_v61 = vpop.f32.mrf.mxu1 }
 0x29c   : > { %v2219_v15 = vadd.f32 %v2218_v40, %v2217_v29  ;;  %v1558_v10 = vadd.f32 %v1510_v61, %v4143_v44 }
 0x29d   : > { %v1873_v23 = vadd.f32 %v1823_v52, %v1713_v20  ;;  %v2335_v25 = vpop.permute.xlu0 %2334 }
 0x29e   : > { %2422 = vst.msk [vmem:[%s4471_s7 + $0x40] sm:$0xff] %vm2041_vm4, %v2335_v25  ;;  %v1985_v1 = vpop.f32.mrf.mxu0 }
 0x29f   : > { %v2032_v39 = vadd.f32 %v1982_v31, %v1873_v23 }
 0x2a1   : > { %2065 = vst.msk [vmem:[%s4235_s26 + $0xb8] sm:$0xff] %vm2041_vm4, %v2032_v39  ;;  %v2119_v51 = vsel %vm2041_vm4, %v2032_v39, 0.0  ;;  %v2166_v32 = vmul.f32 %v2032_v39, %v2032_v39  ;;  %v2277_v54 = vadd.f32 %v4239_v49, %v2032_v39 }
 0x2a2   : > { %v2120_v13 = vadd.f32 %v2119_v51, %v2118_v12  ;;  %v1666_v55 = vpop.f32.mrf.mxu2 }
 0x2a3   : > { %v1826_v58 = vpop.f32.mrf.mxu3  ;;  %v2220_v47 = vsel %vm2041_vm4, %v2166_v32, 0.0  ;;  %v1714_v22 = vadd.f32 %v1666_v55, %v1558_v10  ;;  %2364 = vrot.lane.b32.xlu0 %v2277_v54, %s3043_s30  ;;  %v1513_v4 = vpop.f32.mrf.mxu1 }
 0x2a4   : > { %v2221_v24 = vadd.f32 %v2220_v47, %v2219_v15  ;;  %v1559_v63 = vadd.f32 %v1513_v4, %v4154_v35 }
 0x2a5   : > { %v1874_v16 = vadd.f32 %v1826_v58, %v1714_v22  ;;  %v2337_v44 = vpop.permute.xlu1 %2336 }
 0x2a6   : > { %2423 = vst.msk [vmem:[%s4471_s7 + $0x48] sm:$0xff] %vm2041_vm4, %v2337_v44  ;;  %v1988_v33 = vpop.f32.mrf.mxu0 }
 0x2a7   : > { %v2033_v62 = vadd.f32 %v1985_v1, %v1874_v16 }
 0x2a9   : > { %2066 = vst.msk [vmem:[%s4235_s26 + $0xc0] sm:$0xff] %vm2041_vm4, %v2033_v62  ;;  %v2121_v36 = vsel %vm2041_vm4, %v2033_v62, 0.0  ;;  %v2167_v11 = vmul.f32 %v2033_v62, %v2033_v62  ;;  %v2278_v7 = vadd.f32 %v4239_v49, %v2033_v62 }
 0x2aa   : > { %v2122_v37 = vadd.f32 %v2121_v36, %v2120_v13  ;;  %v1669_v26 = vpop.f32.mrf.mxu2 }
 0x2ab   : > { %v1829_v19 = vpop.f32.mrf.mxu3  ;;  %v2222_v28 = vsel %vm2041_vm4, %v2167_v11, 0.0  ;;  %v1715_v3 = vadd.f32 %v1669_v26, %v1559_v63  ;;  %2366 = vrot.lane.b32.xlu1 %v2278_v7, %s3043_s30  ;;  %v1516_v2 = vpop.f32.mrf.mxu1 }
 0x2ac   : > { %v2223_v50 = vadd.f32 %v2222_v28, %v2221_v24  ;;  %v1560_v48 = vadd.f32 %v1516_v2, %v4165_v53 }
 0x2ad   : > { %v1875_v17 = vadd.f32 %v1829_v19, %v1715_v3  ;;  %v2345_v35 = vpop.permute.xlu2 %2344 }
 0x2ae   : > { %2427 = vst.msk [vmem:[%s4471_s7 + $0x68] sm:$0xff] %vm2041_vm4, %v2345_v35  ;;  %v1991_v14 = vpop.f32.mrf.mxu0 }
 0x2af   : > { %v2034_v45 = vadd.f32 %v1988_v33, %v1875_v17 }
 0x2b1   : > { %2067 = vst.msk [vmem:[%s4235_s26 + $0xc8] sm:$0xff] %vm2041_vm4, %v2034_v45  ;;  %v2123_v57 = vsel %vm2041_vm4, %v2034_v45, 0.0  ;;  %v2168_v21 = vmul.f32 %v2034_v45, %v2034_v45  ;;  %v2279_v5 = vadd.f32 %v4239_v49, %v2034_v45 }
 0x2b2   : > { %v2124_v9 = vadd.f32 %v2123_v57, %v2122_v37  ;;  %v1672_v34 = vpop.f32.mrf.mxu2 }
 0x2b3   : > { %v1832_v46 = vpop.f32.mrf.mxu3  ;;  %v2224_v29 = vsel %vm2041_vm4, %v2168_v21, 0.0  ;;  %v1716_v43 = vadd.f32 %v1672_v34, %v1560_v48  ;;  %2368 = vrot.lane.b32.xlu2 %v2279_v5, %s3043_s30  ;;  %v1519_v56 = vpop.f32.mrf.mxu1 }
 0x2b4   : > { %v2225_v31 = vadd.f32 %v2224_v29, %v2223_v50  ;;  %v1561_v8 = vadd.f32 %v1519_v56, %v4176_v42 }
 0x2b5   : > { %v1876_v38 = vadd.f32 %v1832_v46, %v1716_v43  ;;  %v2341_v53 = vpop.permute.xlu0 %2340 }
 0x2b6   : > { %2425 = vst.msk [vmem:[%s4471_s7 + $0x58] sm:$0xff] %vm2041_vm4, %v2341_v53  ;;  %v1994_v0 = vpop.f32.mrf.mxu0 }
 0x2b7   : > { %v2035_v41 = vadd.f32 %v1991_v14, %v1876_v38 }
 0x2b9   : > { %2068 = vst.msk [vmem:[%s4235_s26 + $0xd0] sm:$0xff] %vm2041_vm4, %v2035_v41  ;;  %v2125_v18 = vsel %vm2041_vm4, %v2035_v41, 0.0  ;;  %v2169_v12 = vmul.f32 %v2035_v41, %v2035_v41  ;;  %v2280_v60 = vadd.f32 %v4239_v49, %v2035_v41 }
 0x2ba   : > { %v2126_v52 = vadd.f32 %v2125_v18, %v2124_v9  ;;  %v1675_v40 = vpop.f32.mrf.mxu2 }
 0x2bb   : > { %v1835_v20 = vpop.f32.mrf.mxu3  ;;  %v2226_v61 = vsel %vm2041_vm4, %v2169_v12, 0.0  ;;  %v1717_v15 = vadd.f32 %v1675_v40, %v1561_v8  ;;  %2370 = vrot.lane.b32.xlu0 %v2280_v60, %s3043_s30  ;;  %v1522_v23 = vpop.f32.mrf.mxu1 }
 0x2bc   : > { %v2227_v25 = vadd.f32 %v2226_v61, %v2225_v31  ;;  %v1562_v51 = vadd.f32 %v1522_v23, %v4187_v30 }
 0x2bd   : > { %v1877_v1 = vadd.f32 %v1835_v20, %v1717_v15  ;;  %v2343_v42 = vpop.permute.xlu1 %2342 }
 0x2be   : > { %2426 = vst.msk [vmem:[%s4471_s7 + $0x60] sm:$0xff] %vm2041_vm4, %v2343_v42  ;;  %v1997_v39 = vpop.f32.mrf.mxu0 }
 0x2bf   : > { %v2036_v10 = vadd.f32 %v1994_v0, %v1877_v1 }
 0x2c1   : > { %2069 = vst.msk [vmem:[%s4235_s26 + $0xd8] sm:$0xff] %vm2041_vm4, %v2036_v10  ;;  %v2127_v32 = vsel %vm2041_vm4, %v2036_v10, 0.0  ;;  %v2170_v54 = vmul.f32 %v2036_v10, %v2036_v10  ;;  %v2281_v13 = vadd.f32 %v4239_v49, %v2036_v10 }
 0x2c2   : > { %v2128_v55 = vadd.f32 %v2127_v32, %v2126_v52  ;;  %v1678_v58 = vpop.f32.mrf.mxu2 }
 0x2c3   : > { %v1838_v47 = vpop.f32.mrf.mxu3  ;;  %v2228_v22 = vsel %vm2041_vm4, %v2170_v54, 0.0  ;;  %v1718_v4 = vadd.f32 %v1678_v58, %v1562_v51  ;;  %2372 = vrot.lane.b32.xlu1 %v2281_v13, %s3043_s30  ;;  %v1525_v24 = vpop.f32.mrf.mxu1 }
 0x2c4   : > { %v2229_v16 = vadd.f32 %v2228_v22, %v2227_v25  ;;  %v1563_v63 = vadd.f32 %v1525_v24, %v4198_v59 }
 0x2c5   : > { %v1878_v44 = vadd.f32 %v1838_v47, %v1718_v4  ;;  %v2351_v30 = vpop.permute.xlu2 %2350 }
 0x2c6   : > { %2430 = vst.msk [vmem:[%s4471_s7 + $0x80] sm:$0xff] %vm2041_vm4, %v2351_v30  ;;  %v2000_v62 = vpop.f32.mrf.mxu0 }
 0x2c7   : > { %v2037_v33 = vadd.f32 %v1997_v39, %v1878_v44 }
 0x2c9   : > { %2070 = vst.msk [vmem:[%s4235_s26 + $0xe0] sm:$0xff] %vm2041_vm4, %v2037_v33  ;;  %v2129_v36 = vsel %vm2041_vm4, %v2037_v33, 0.0  ;;  %v2171_v11 = vmul.f32 %v2037_v33, %v2037_v33  ;;  %v2282_v7 = vadd.f32 %v4239_v49, %v2037_v33 }
 0x2ca   : > { %v2130_v37 = vadd.f32 %v2129_v36, %v2128_v55  ;;  %v1681_v26 = vpop.f32.mrf.mxu2 }
 0x2cb   : > { %v1841_v19 = vpop.f32.mrf.mxu3  ;;  %v2230_v28 = vsel %vm2041_vm4, %v2171_v11, 0.0  ;;  %v1719_v3 = vadd.f32 %v1681_v26, %v1563_v63  ;;  %2374 = vrot.lane.b32.xlu2 %v2282_v7, %s3043_s30  ;;  %v1528_v50 = vpop.f32.mrf.mxu1 }
 0x2cc   : > { %v2231_v2 = vadd.f32 %v2230_v28, %v2229_v16  ;;  %v1564_v14 = vadd.f32 %v1528_v50, %v4209_v6 }
 0x2cd   : > { %v1879_v17 = vadd.f32 %v1841_v19, %v1719_v3  ;;  %v2347_v59 = vpop.permute.xlu0 %2346 }
 0x2ce   : > { %2428 = vst.msk [vmem:[%s4471_s7 + $0x70] sm:$0xff] %vm2041_vm4, %v2347_v59  ;;  %v2003_v21 = vpop.f32.mrf.mxu0 }
 0x2cf   : > { %v2038_v35 = vadd.f32 %v2000_v62, %v1879_v17 }
 0x2d1   : > { %2071 = vst.msk [vmem:[%s4235_s26 + $0xe8] sm:$0xff] %vm2041_vm4, %v2038_v35  ;;  %v2131_v45 = vsel %vm2041_vm4, %v2038_v35, 0.0  ;;  %v2172_v48 = vmul.f32 %v2038_v35, %v2038_v35  ;;  %v2283_v57 = vadd.f32 %v4239_v49, %v2038_v35 }
 0x2d2   : > { %v2132_v5 = vadd.f32 %v2131_v45, %v2130_v37  ;;  %v1684_v9 = vpop.f32.mrf.mxu2 }
 0x2d3   : > { %v1844_v34 = vpop.f32.mrf.mxu3  ;;  %v2232_v46 = vsel %vm2041_vm4, %v2172_v48, 0.0  ;;  %v1720_v29 = vadd.f32 %v1684_v9, %v1564_v14  ;;  %2376 = vrot.lane.b32.xlu0 %v2283_v57, %s3043_s30  ;;  %v1531_v31 = vpop.f32.mrf.mxu1 }
 0x2d4   : > { %v2233_v43 = vadd.f32 %v2232_v46, %v2231_v2  ;;  %v1565_v53 = vadd.f32 %v1531_v31, %v4220_v27 }
 0x2d5   : > { %v1880_v6 = vadd.f32 %v1844_v34, %v1720_v29  ;;  %v2349_v56 = vpop.permute.xlu1 %2348 }
 0x2d6   : > { %2429 = vst.msk [vmem:[%s4471_s7 + $0x78] sm:$0xff] %vm2041_vm4, %v2349_v56  ;;  %v2006_v61 = vpop.f32.mrf.mxu0 }
 0x2d7   : > { %v2039_v38 = vadd.f32 %v2003_v21, %v1880_v6 }
 0x2d9   : > { %2072 = vst.msk [vmem:[%s4235_s26 + $0xf0] sm:$0xff] %vm2041_vm4, %v2039_v38  ;;  %v2133_v0 = vsel %vm2041_vm4, %v2039_v38, 0.0  ;;  %v2173_v41 = vmul.f32 %v2039_v38, %v2039_v38  ;;  %v2284_v8 = vadd.f32 %v4239_v49, %v2039_v38 }
 0x2da   : > { %v2134_v18 = vadd.f32 %v2133_v0, %v2132_v5  ;;  %v1687_v12 = vpop.f32.mrf.mxu2 }
 0x2db   : > { %v1847_v60 = vpop.f32.mrf.mxu3  ;;  %v2234_v52 = vsel %vm2041_vm4, %v2173_v41, 0.0  ;;  %v1721_v40 = vadd.f32 %v1687_v12, %v1565_v53  ;;  %2378 = vrot.lane.b32.xlu1 %v2284_v8, %s3043_s30 }
 0x2dc   : > { %v2235_v20 = vadd.f32 %v2234_v52, %v2233_v43 }
 0x2dd   : > { %v1881_v15 = vadd.f32 %v1847_v60, %v1721_v40  ;;  %v2357_v27 = vpop.permute.xlu2 %2356 }
 0x2de   : > { %2433 = vst.msk [vmem:[%s4471_s7 + $0x98] sm:$0xff] %vm2041_vm4, %v2357_v27 }
 0x2df   : > { %v2040_v23 = vadd.f32 %v2006_v61, %v1881_v15 }
 0x2e1   : > { %2073 = vst.msk [vmem:[%s4235_s26 + $0xf8] sm:$0xff] %vm2041_vm4, %v2040_v23  ;;  %v2135_v25 = vsel %vm2041_vm4, %v2040_v23, 0.0  ;;  %v2174_v1 = vmul.f32 %v2040_v23, %v2040_v23  ;;  %v2285_v42 = vadd.f32 %v4239_v49, %v2040_v23 }
 0x2e2   : > { %v2136_v39 = vadd.f32 %v2135_v25, %v2134_v18 }
 0x2e3   : > { %v2236_v10 = vsel %vm2041_vm4, %v2174_v1, 0.0  ;;  %2380 = vrot.lane.b32.xlu2 %v2285_v42, %s3043_s30 }
 0x2e4   : > { %v2137_v51 = vrot.slane %v2136_v39, 4  ;;  %v2237_v32 = vadd.f32 %v2236_v10, %v2235_v20 }
 0x2e5   : > { %v2353_v54 = vpop.permute.xlu0 %2352 }
 0x2e6   : > { %v2138_v13 = vadd.f32 %v2137_v51, %v2136_v39  ;;  %v2238_v55 = vrot.slane %v2237_v32, 4  ;;  %2431 = vst.msk [vmem:[%s4471_s7 + $0x88] sm:$0xff] %vm2041_vm4, %v2353_v54 }
 0x2e8   : > { %v2139_v58 = vrot.slane %v2138_v13, 2  ;;  %v2239_v47 = vadd.f32 %v2238_v55, %v2237_v32 }
 0x2ea   : > { %v2140_v22 = vadd.f32 %v2139_v58, %v2138_v13  ;;  %v2240_v49 = vrot.slane %v2239_v47, 2 }
 0x2ec   : > { %v2141_v4 = vrot.slane %v2140_v22, 1  ;;  %v2241_v24 = vadd.f32 %v2240_v49, %v2239_v47 }
 0x2ed   : > { %v2355_v16 = vpop.permute.xlu1 %2354 }
 0x2ee   : > { %2432 = vst.msk [vmem:[%s4471_s7 + $0x90] sm:$0xff] %vm2041_vm4, %v2355_v16  ;;  %v2242_v44 = vrot.slane %v2241_v24, 1  ;;  %v2142_v30 = vadd.f32 %v2141_v4, %v2140_v22 }
 0x2f0   : > { %v2243_v33 = vadd.f32 %v2242_v44, %v2241_v24 }
 0x2f2   : > { %v2245_v62 = vsel %vm2244_vm5, %v2142_v30, %v2243_v33 }
 0x2f3   : > { %2247 = vst.msk [vmem:[%s225_s14] sm:$0x3] %vm2246_vm6, %v2245_v62 }
 0x2f4   : > { %3005 = shalt.err (!%p3002_p3)
}
 0x2f5   : > { %2912 = dma.vmem_to_hbm [thread:$0]  (%p3112_p5), %s2473_s15, 32, %s2475_s16, %s2452_s22   ;;  %v2363_v63 = vpop.permute.xlu2 %2362 }
 0x2f6   : > { %2436 = vst.msk [vmem:[%s4471_s7 + $0xb0] sm:$0xff] %vm2041_vm4, %v2363_v63 }
 0x2fd   : > { %v2359_v36 = vpop.permute.xlu0 %2358 }
 0x2fe   : > { %2434 = vst.msk [vmem:[%s4471_s7 + $0xa0] sm:$0xff] %vm2041_vm4, %v2359_v36 }
 0x305   : > { %v2361_v11 = vpop.permute.xlu1 %2360 }
 0x306   : > { %2435 = vst.msk [vmem:[%s4471_s7 + $0xa8] sm:$0xff] %vm2041_vm4, %v2361_v11 }
 0x30d   : > { %v2369_v7 = vpop.permute.xlu2 %2368 }
 0x30e   : > { %2439 = vst.msk [vmem:[%s4471_s7 + $0xc8] sm:$0xff] %vm2041_vm4, %v2369_v7 }
 0x315   : > { %v2365_v37 = vpop.permute.xlu0 %2364 }
 0x316   : > { %2437 = vst.msk [vmem:[%s4471_s7 + $0xb8] sm:$0xff] %vm2041_vm4, %v2365_v37 }
 0x31d   : > { %v2367_v26 = vpop.permute.xlu1 %2366 }
 0x31e   : > { %2438 = vst.msk [vmem:[%s4471_s7 + $0xc0] sm:$0xff] %vm2041_vm4, %v2367_v26 }
 0x325   : > { %v2375_v19 = vpop.permute.xlu2 %2374 }
 0x326   : > { %2442 = vst.msk [vmem:[%s4471_s7 + $0xe0] sm:$0xff] %vm2041_vm4, %v2375_v19 }
 0x32d   : > { %v2371_v28 = vpop.permute.xlu0 %2370 }
 0x32e   : > { %2440 = vst.msk [vmem:[%s4471_s7 + $0xd0] sm:$0xff] %vm2041_vm4, %v2371_v28 }
 0x335   : > { %v2373_v3 = vpop.permute.xlu1 %2372 }
 0x336   : > { %2441 = vst.msk [vmem:[%s4471_s7 + $0xd8] sm:$0xff] %vm2041_vm4, %v2373_v3 }
 0x33d   : > { %v2381_v2 = vpop.permute.xlu2 %2380 }
 0x33e   : > { %2445 = vst.msk [vmem:[%s4471_s7 + $0xf8] sm:$0xff] %vm2041_vm4, %v2381_v2 }
 0x345   : > { %v2377_v50 = vpop.permute.xlu0 %2376 }
 0x346   : > { %2443 = vst.msk [vmem:[%s4471_s7 + $0xe8] sm:$0xff] %vm2041_vm4, %v2377_v50 }
 0x34d   : > { %v2379_v17 = vpop.permute.xlu1 %2378 }
 0x34e   : > { %2444 = vst.msk [vmem:[%s4471_s7 + $0xf0] sm:$0xff] %vm2041_vm4, %v2379_v17 }
 0x34f PF: > { %p2918_p4 = scmp.ge.s32.totalorder %s3040_s21, 2  ;;  %s2497_s28 = sand.u32 1, %s3028_s18  }
 0x350   : > { %s2498_s13 = scalar_lea.sflag [#allocation3], %s2497_s28 }
 0x351   : > { %p2915_p5 = pnand %p2918_p4, %p3116_p6 }
 0x353   : > { %p2916_p7 = pneg %p2915_p5 }
 0x355   : > { %3023 = dma.done.wait (%p2916_p7), %s2498_s13, 32  }
 0x356   : > { %3025 = vsyncadd (%p2916_p7), %s2498_s13, 4294967264  ;;  %p16_p8 = scmp.ge.s32.totalorder %s3099_s24, 4   ;;  %s4908_s18 = smov %s3032_s19 }
 0x357   : > { %s4909_s19 = smov %s3036_s20  ;;  %s4910_s20 = smov %s3110_s27 }
 0x358   : > { %s4911_s21 = smov %s3099_s24  ;;  %18 = sbr.rel (!%p16_p8) target bundleno = 3 (0x3), region = 99 }
 0x35d   :  { %2512 = vsyncpa [#allocation3], 1 }
 0x35e   :  { %2514 = vsyncpa [#allocation3 + $0x1], 1 }

</bundles_post_ra>
